<compile_context>
chip_gen: v6e
topology: v6e:2x2x1
jax: 0.10.0
libtpu: 0.0.40
codegen_flags: <defaults>
</compile_context>

<pallas_src>
import numpy as np
import jax
import jax.numpy as jnp
from jax.experimental import pallas as pl
from jax.experimental.pallas import tpu as pltpu

_MXU_DTYPE = jnp.bfloat16  # matmul-operand dtype (f32 accumulation); jnp.float32 for bit-exact matmuls


def _round_up(n, m):
    return ((n + m - 1) // m) * m


# ---------------------------------------------------------------------------
# Fused kernel: whole WOSN forward for a block of BB batch elements.
# All activations are spatial-major / batch-minor so trailing (BB, C) tiles stay intact.
# ---------------------------------------------------------------------------
def wosn_kernel(p_ref,             # (100, BB, 50) bf16  conv1 im2col patches, rows = h*10 + w
                w1_ref, b1_ref,    # (50, 32) bf16, (1, 32) f32
                w2_ref, b2_ref,    # (128, 49) bf16 [K = (kh*2+kw)*32 + c], (1, 49) f32
                w3_ref, b3_ref,    # (196, 100) bf16 [K = ph*98 + pw*49 + c], (1, 100) f32
                w23_ref, b23_ref,  # (1, 100) f32, (1, 1) f32  (folded fc2 ∘ fc3)
                o_ref):            # (1, BB) f32
    f32 = jnp.float32
    BB = p_ref.shape[1]

    # ---- conv1: one (100*BB, 50) x (50, 32) matmul (bias is pool-invariant) ----
    p = p_ref[...].reshape(100 * BB, 50)
    m1 = jnp.dot(p, w1_ref[...], preferred_element_type=f32) + b1_ref[...]   # (100*BB, 32)
    # 2x2 max-pool over the 10x10 conv1 grid; rows = (h*10 + w)*BB + b.
    m1 = m1.reshape(50, 2, BB, 32)
    m1 = jnp.maximum(m1[:, 0], m1[:, 1])                 # max over dw -> (50, BB, 32)
    m1 = m1.reshape(5, 2, 5, BB, 32)
    m1 = jnp.maximum(m1[:, 0], m1[:, 1])                 # max over dh -> (5, 5, BB, 32)
    h1 = jnp.maximum(m1, 0.0).astype(w1_ref.dtype)       # relu, back to matmul dtype

    # ---- conv2 (k=2): 4 taps lane-concatenated -> single K=128 matmul ----
    lhs2 = jnp.concatenate(
        [h1[0:4, 0:4], h1[0:4, 1:5], h1[1:5, 0:4], h1[1:5, 1:5]],
        axis=-1)                                          # (4, 4, BB, 128), lane = (kh*2+kw)*32 + c
    m2 = jnp.dot(lhs2.reshape(16 * BB, 128), w2_ref[...],
                 preferred_element_type=f32) + b2_ref[...]  # (16*BB, 49), rows = (ho*4+wo)*BB + b
    # 2x2 max-pool over the 4x4 conv2 grid.
    m2 = m2.reshape(8, 2, BB, 49)
    m2 = jnp.maximum(m2[:, 0], m2[:, 1])                 # max over dw -> (8, BB, 49)
    m2 = m2.reshape(2, 2, 2, BB, 49)
    m2 = jnp.maximum(m2[:, 0], m2[:, 1])                 # max over dh -> (2, 2, BB, 49) = (ph, pw, b, c)
    h2 = jnp.maximum(m2, 0.0)

    # ---- fc1: quadrants lane-concatenated -> one (BB, 196) x (196, 100) matmul + relu ----
    lhs3 = jnp.concatenate([h2[0, 0], h2[0, 1], h2[1, 0], h2[1, 1]], axis=-1)   # (BB, 196)
    a1 = jnp.dot(lhs3.astype(w3_ref.dtype), w3_ref[...],
                 preferred_element_type=f32) + b3_ref[...]                      # (BB, 100)
    a1 = jnp.maximum(a1, 0.0)

    # ---- folded fc2 ∘ fc3 (VPU mul + lane reduce), relu, sigmoid, lane-dense store ----
    z = jnp.sum(a1 * w23_ref[...], axis=-1, keepdims=True) + b23_ref[...]       # (BB, 1)
    z = jnp.maximum(z, 0.0)
    y = pl.reciprocal(1.0 + jnp.exp(-z), approx=False)                          # exact sigmoid
    o_ref[...] = y.reshape(1, BB)


# ---------------------------------------------------------------------------
# Wrapper: one im2col HLO (bf16), one relayout, one fused pallas_call.
# ---------------------------------------------------------------------------
def wosn_forward(x, params, block_b=128):
    """x: (B, 2, 14, 14) NCHW float32. Returns (None, sigmoid output of shape (B, 1))."""
    B = x.shape[0]
    assert x.shape[1:] == (2, 14, 14), "WOSN's flatten to 196 implies a (2, 14, 14) input"

    BB = _round_up(min(block_b, max(8, _round_up(B, 8))), 8)
    B_pad = _round_up(B, BB)
    nb = B_pad // BB

    # conv1 im2col with one XLA HLO, produced directly in the matmul operand dtype.
    xb = x.astype(_MXU_DTYPE)
    pr = jax.lax.conv_general_dilated_patches(
        xb, filter_shape=(5, 5), window_strides=(1, 1), padding="VALID")  # (B, 50, 10, 10)
    # Spatial-major / batch-minor rows (single relayout); pooling happens in-kernel.
    pr = jnp.transpose(pr, (2, 3, 0, 1)).reshape(100, B, 50)              # row = h*10 + w
    if B_pad != B:
        pr = jnp.pad(pr, ((0, 0), (0, B_pad - B), (0, 0)))

    itemsize = jnp.dtype(_MXU_DTYPE).itemsize
    flops = int(B_pad) * 560_104                     # conv1 + conv2 + fc1 + folded tail
    bytes_accessed = int(B_pad) * (100 * 50 * itemsize + 4) + 60_000

    out = pl.pallas_call(
        wosn_kernel,
        out_shape=jax.ShapeDtypeStruct((nb, BB), jnp.float32),
        grid=(nb,),
        in_specs=[
            pl.BlockSpec((100, BB, 50), lambda b: (0, b, 0)),   # patches (per-batch-block)
            pl.BlockSpec((50, 32), lambda b: (0, 0)),           # w1
            pl.BlockSpec((1, 32), lambda b: (0, 0)),            # b1
            pl.BlockSpec((128, 49), lambda b: (0, 0)),          # w2 (taps along K)
            pl.BlockSpec((1, 49), lambda b: (0, 0)),            # b2
            pl.BlockSpec((196, 100), lambda b: (0, 0)),         # w3 (fc1, flatten-permuted)
            pl.BlockSpec((1, 100), lambda b: (0, 0)),           # b3
            pl.BlockSpec((1, 100), lambda b: (0, 0)),           # w23 (folded fc2∘fc3)
            pl.BlockSpec((1, 1), lambda b: (0, 0)),             # b23
        ],
        out_specs=pl.BlockSpec((1, BB), lambda b: (b, 0)),
        compiler_params=pltpu.CompilerParams(dimension_semantics=("parallel",)),
        cost_estimate=pl.CostEstimate(flops=flops, transcendentals=int(B_pad),
                                      bytes_accessed=bytes_accessed),
    )(pr, params["w1"], params["b1"], params["w2"], params["b2"],
      params["w3"], params["b3"], params["w23"], params["b23"])

    y = out.reshape(B_pad)[:B].reshape(B, 1)
    return (None, y)


# ---------------------------------------------------------------------------
# Deterministic parameter init (PyTorch shapes, re-laid-out for the kernel)
# ---------------------------------------------------------------------------
def _conv1_patch_feature_perm(C=2, H=14, W=14, k=5):
    """patch-feature index -> PyTorch (c, kh, kw) flat index, decoded with an index probe
    so the weight layout matches whatever ordering conv_general_dilated_patches uses."""
    probe = jnp.arange(C * H * W, dtype=jnp.float32).reshape(1, C, H, W)
    pr = jax.lax.conv_general_dilated_patches(
        probe, filter_shape=(k, k), window_strides=(1, 1), padding="VALID",
        precision=jax.lax.Precision.HIGHEST)
    flat = np.asarray(pr[0, :, 0, 0]).round().astype(np.int64)   # = c*H*W + kh*W + kw
    c, rem = flat // (H * W), flat % (H * W)
    kh, kw = rem // W, rem % W
    perm = c * (k * k) + kh * k + kw
    assert sorted(perm.tolist()) == list(range(C * k * k))
    return perm


def init_params(key):
    ks = jax.random.split(key, 10)

    def u(k, shape, scale):
        return jax.random.uniform(k, shape, jnp.float32, -scale, scale)

    # PyTorch-shaped parameters.
    raw = {
        "conv1_w": u(ks[0], (32, 2, 5, 5), (2 * 5 * 5) ** -0.5),
        "conv1_b": u(ks[1], (32,), 0.1),
        "conv2_w": u(ks[2], (49, 32, 2, 2), (32 * 2 * 2) ** -0.5),
        "conv2_b": u(ks[3], (49,), 0.1),
        "fc1_w": u(ks[4], (100, 196), 196 ** -0.5),
        "fc1_b": u(ks[5], (100,), 0.1),
        "fc2_w": u(ks[6], (10, 100), 100 ** -0.5),
        "fc2_b": u(ks[7], (10,), 0.1),
        "fc3_w": u(ks[8], (1, 10), 10 ** -0.5),
        "fc3_b": u(ks[9], (1,), 0.1),
    }
    hi = jax.lax.Precision.HIGHEST

    # conv1: rows permuted to match the im2col patch-feature order.   (50, 32)
    perm = _conv1_patch_feature_perm()
    w1 = raw["conv1_w"].reshape(32, 50)[:, perm].T.astype(_MXU_DTYPE)

    # conv2: taps concatenated along K -> (128, 49), K = (kh*2+kw)*32 + c.
    w2 = jnp.transpose(raw["conv2_w"], (2, 3, 1, 0)).reshape(128, 49).astype(_MXU_DTYPE)

    # fc1 with PyTorch's NCHW .view(-1, 196) permutation folded in -> (196, 100),
    # row index = ph*98 + pw*49 + c (the kernel's lane-concat order).
    w3 = jnp.transpose(raw["fc1_w"].reshape(100, 49, 2, 2), (2, 3, 1, 0)).reshape(196, 100)
    w3 = w3.astype(_MXU_DTYPE)

    # fc2 ∘ fc3 folded into a single affine map (exact: no activation between them).
    w23 = jnp.dot(raw["fc3_w"], raw["fc2_w"], precision=hi)                                   # (1, 100)
    b23 = jnp.dot(raw["fc2_b"].reshape(1, 10), raw["fc3_w"].T, precision=hi) + raw["fc3_b"].reshape(1, 1)

    params = {
        "w1": w1, "b1": raw["conv1_b"].reshape(1, 32),
        "w2": w2, "b2": raw["conv2_b"].reshape(1, 49),
        "w3": w3, "b3": raw["fc1_b"].reshape(1, 100),
        "w23": w23, "b23": b23,
    }
    return params, raw


# ---------------------------------------------------------------------------
# Pure-JAX f32 reference of the PyTorch forward (for a tolerance check)
# ---------------------------------------------------------------------------
def _maxpool2x2_nchw(a):
    B, C, H, W = a.shape
    return a.reshape(B, C, H // 2, 2, W // 2, 2).max(axis=(3, 5))


def reference_forward(x, raw):
    hi = jax.lax.Precision.HIGHEST
    dn = ("NCHW", "OIHW", "NCHW")
    a = jax.lax.conv_general_dilated(x, raw["conv1_w"], (1, 1), "VALID",
                                     dimension_numbers=dn, precision=hi)
    a = a + raw["conv1_b"].reshape(1, -1, 1, 1)
    a = jnp.maximum(_maxpool2x2_nchw(a), 0.0)
    a = jax.lax.conv_general_dilated(a, raw["conv2_w"], (1, 1), "VALID",
                                     dimension_numbers=dn, precision=hi)
    a = a + raw["conv2_b"].reshape(1, -1, 1, 1)
    a = jnp.maximum(_maxpool2x2_nchw(a), 0.0)
    a = a.reshape(a.shape[0], -1)                                      # NCHW flatten -> (B, 196)
    a = jnp.maximum(jnp.dot(a, raw["fc1_w"].T, precision=hi) + raw["fc1_b"], 0.0)
    a = jnp.dot(a, raw["fc2_w"].T, precision=hi) + raw["fc2_b"]
    a = jnp.dot(a, raw["fc3_w"].T, precision=hi) + raw["fc3_b"]
    return jax.nn.sigmoid(jnp.maximum(a, 0.0))


if __name__ == "__main__":
    key = jax.random.PRNGKey(0)
    k_x, k_p = jax.random.split(key)
    # WOSN's flatten to 196 = 49*2*2 implies a 14x14 spatial input with 2 channels.
    x = jax.random.normal(k_x, (2, 2, 14, 14), dtype=jnp.float32)
    params, raw = init_params(k_p)

    fwd = jax.jit(wosn_forward)
    none_out, y = fwd(x, params)
    y = jax.block_until_ready(y)
    assert none_out is None
    assert y.shape == (2, 1) and y.dtype == jnp.float32
    assert bool(jnp.all(jnp.isfinite(y)))

    y_ref = reference_forward(x, raw)
    err = float(jnp.max(jnp.abs(y - y_ref)))
    assert err < 3e-2, f"max abs err vs reference = {err}"
    print("KERNEL_OK")
</pallas_src>

<mosaic_0001>
module attributes {stable_mosaic.version = 11 : i64} {
  func.func @wosn_kernel(%arg0: i32, %arg1: memref<100x8x50xbf16, #tpu.memory_space<vmem>>, %arg2: memref<50x32xbf16, #tpu.memory_space<vmem>>, %arg3: memref<1x32xf32, #tpu.memory_space<vmem>>, %arg4: memref<128x49xbf16, #tpu.memory_space<vmem>>, %arg5: memref<1x49xf32, #tpu.memory_space<vmem>>, %arg6: memref<196x100xbf16, #tpu.memory_space<vmem>>, %arg7: memref<1x100xf32, #tpu.memory_space<vmem>>, %arg8: memref<1x100xf32, #tpu.memory_space<vmem>>, %arg9: memref<1x1xf32, #tpu.memory_space<vmem>>, %arg10: memref<1x8xf32, #tpu.memory_space<vmem>>) attributes {dimension_semantics = [#tpu.dimension_semantics<parallel>], iteration_bounds = array<i64: 1>, scalar_prefetch = 0 : i64, scratch_operands = 0 : i64, tpu.core_type = #tpu.core_type<tc>, window_params = [{transform_indices = @transform_0, window_bounds = array<i64: 100, 8, 50>}, {pipeline_mode = #tpu.pipeline_mode<synchronous>, transform_indices = @transform_1, window_bounds = array<i64: 50, 32>}, {pipeline_mode = #tpu.pipeline_mode<synchronous>, transform_indices = @transform_2, window_bounds = array<i64: 1, 32>}, {pipeline_mode = #tpu.pipeline_mode<synchronous>, transform_indices = @transform_3, window_bounds = array<i64: 128, 49>}, {pipeline_mode = #tpu.pipeline_mode<synchronous>, transform_indices = @transform_4, window_bounds = array<i64: 1, 49>}, {pipeline_mode = #tpu.pipeline_mode<synchronous>, transform_indices = @transform_5, window_bounds = array<i64: 196, 100>}, {pipeline_mode = #tpu.pipeline_mode<synchronous>, transform_indices = @transform_6, window_bounds = array<i64: 1, 100>}, {pipeline_mode = #tpu.pipeline_mode<synchronous>, transform_indices = @transform_7, window_bounds = array<i64: 1, 100>}, {pipeline_mode = #tpu.pipeline_mode<synchronous>, transform_indices = @transform_8, window_bounds = array<i64: 1, 1>}, {transform_indices = @transform_9, window_bounds = array<i64: 1, 8>}]} {
    %c0 = arith.constant 0 : index
    %c0_0 = arith.constant 0 : index
    %c0_1 = arith.constant 0 : index
    %0 = vector.load %arg1[%c0, %c0_0, %c0_1] : memref<100x8x50xbf16, #tpu.memory_space<vmem>>, vector<100x8x50xbf16>
    %1 = vector.shape_cast %0 : vector<100x8x50xbf16> to vector<800x50xbf16>
    %c0_2 = arith.constant 0 : index
    %c0_3 = arith.constant 0 : index
    %2 = vector.load %arg2[%c0_2, %c0_3] : memref<50x32xbf16, #tpu.memory_space<vmem>>, vector<50x32xbf16>
    %cst = arith.constant dense<0.000000e+00> : vector<800x32xf32>
    %3 = tpu.matmul %1, %2, %cst {dimension_numbers = #tpu.dot_dimension_numbers<[1], [0], [0], [1], [0, 0, 1, 1], [], []>} : vector<800x50xbf16>, vector<50x32xbf16>, vector<800x32xf32> -> vector<800x32xf32>
    %c0_4 = arith.constant 0 : index
    %c0_5 = arith.constant 0 : index
    %4 = vector.load %arg3[%c0_4, %c0_5] : memref<1x32xf32, #tpu.memory_space<vmem>>, vector<1x32xf32>
    %5 = vector.broadcast %4 : vector<1x32xf32> to vector<800x32xf32>
    %6 = arith.addf %3, %5 : vector<800x32xf32>
    %7 = vector.shape_cast %6 : vector<800x32xf32> to vector<50x2x8x32xf32>
    %8 = vector.extract_strided_slice %7 {offsets = [0, 0, 0, 0], sizes = [50, 1, 8, 32], strides = [1, 1, 1, 1]} : vector<50x2x8x32xf32> to vector<50x1x8x32xf32>
    %9 = vector.shape_cast %8 : vector<50x1x8x32xf32> to vector<50x8x32xf32>
    %10 = vector.extract_strided_slice %7 {offsets = [0, 1, 0, 0], sizes = [50, 1, 8, 32], strides = [1, 1, 1, 1]} : vector<50x2x8x32xf32> to vector<50x1x8x32xf32>
    %11 = vector.shape_cast %10 : vector<50x1x8x32xf32> to vector<50x8x32xf32>
    %12 = arith.maximumf %9, %11 : vector<50x8x32xf32>
    %13 = vector.shape_cast %12 : vector<50x8x32xf32> to vector<5x2x5x8x32xf32>
    %14 = vector.extract_strided_slice %13 {offsets = [0, 0, 0, 0, 0], sizes = [5, 1, 5, 8, 32], strides = [1, 1, 1, 1, 1]} : vector<5x2x5x8x32xf32> to vector<5x1x5x8x32xf32>
    %15 = vector.shape_cast %14 : vector<5x1x5x8x32xf32> to vector<5x5x8x32xf32>
    %16 = vector.extract_strided_slice %13 {offsets = [0, 1, 0, 0, 0], sizes = [5, 1, 5, 8, 32], strides = [1, 1, 1, 1, 1]} : vector<5x2x5x8x32xf32> to vector<5x1x5x8x32xf32>
    %17 = vector.shape_cast %16 : vector<5x1x5x8x32xf32> to vector<5x5x8x32xf32>
    %18 = arith.maximumf %15, %17 : vector<5x5x8x32xf32>
    %cst_6 = arith.constant 0.000000e+00 : f32
    %19 = vector.broadcast %cst_6 : f32 to vector<5x5x8x32xf32>
    %20 = arith.maximumf %18, %19 : vector<5x5x8x32xf32>
    %21 = arith.truncf %20 : vector<5x5x8x32xf32> to vector<5x5x8x32xbf16>
    %22 = vector.extract_strided_slice %21 {offsets = [0, 0, 0, 0], sizes = [4, 4, 8, 32], strides = [1, 1, 1, 1]} : vector<5x5x8x32xbf16> to vector<4x4x8x32xbf16>
    %23 = vector.extract_strided_slice %21 {offsets = [0, 1, 0, 0], sizes = [4, 4, 8, 32], strides = [1, 1, 1, 1]} : vector<5x5x8x32xbf16> to vector<4x4x8x32xbf16>
    %24 = vector.extract_strided_slice %21 {offsets = [1, 0, 0, 0], sizes = [4, 4, 8, 32], strides = [1, 1, 1, 1]} : vector<5x5x8x32xbf16> to vector<4x4x8x32xbf16>
    %25 = vector.extract_strided_slice %21 {offsets = [1, 1, 0, 0], sizes = [4, 4, 8, 32], strides = [1, 1, 1, 1]} : vector<5x5x8x32xbf16> to vector<4x4x8x32xbf16>
    %26 = tpu.concatenate %22, %23, %24, %25 in 3 : vector<4x4x8x32xbf16>, vector<4x4x8x32xbf16>, vector<4x4x8x32xbf16>, vector<4x4x8x32xbf16> -> vector<4x4x8x128xbf16>
    %27 = vector.shape_cast %26 : vector<4x4x8x128xbf16> to vector<128x128xbf16>
    %c0_7 = arith.constant 0 : index
    %c0_8 = arith.constant 0 : index
    %28 = vector.load %arg4[%c0_7, %c0_8] : memref<128x49xbf16, #tpu.memory_space<vmem>>, vector<128x49xbf16>
    %cst_9 = arith.constant dense<0.000000e+00> : vector<128x49xf32>
    %29 = tpu.matmul %27, %28, %cst_9 {dimension_numbers = #tpu.dot_dimension_numbers<[1], [0], [0], [1], [0, 0, 1, 1], [], []>} : vector<128x128xbf16>, vector<128x49xbf16>, vector<128x49xf32> -> vector<128x49xf32>
    %c0_10 = arith.constant 0 : index
    %c0_11 = arith.constant 0 : index
    %30 = vector.load %arg5[%c0_10, %c0_11] : memref<1x49xf32, #tpu.memory_space<vmem>>, vector<1x49xf32>
    %31 = vector.broadcast %30 : vector<1x49xf32> to vector<128x49xf32>
    %32 = arith.addf %29, %31 : vector<128x49xf32>
    %33 = vector.shape_cast %32 : vector<128x49xf32> to vector<8x2x8x49xf32>
    %34 = vector.extract_strided_slice %33 {offsets = [0, 0, 0, 0], sizes = [8, 1, 8, 49], strides = [1, 1, 1, 1]} : vector<8x2x8x49xf32> to vector<8x1x8x49xf32>
    %35 = vector.shape_cast %34 : vector<8x1x8x49xf32> to vector<8x8x49xf32>
    %36 = vector.extract_strided_slice %33 {offsets = [0, 1, 0, 0], sizes = [8, 1, 8, 49], strides = [1, 1, 1, 1]} : vector<8x2x8x49xf32> to vector<8x1x8x49xf32>
    %37 = vector.shape_cast %36 : vector<8x1x8x49xf32> to vector<8x8x49xf32>
    %38 = arith.maximumf %35, %37 : vector<8x8x49xf32>
    %39 = vector.shape_cast %38 : vector<8x8x49xf32> to vector<2x2x2x8x49xf32>
    %40 = vector.extract_strided_slice %39 {offsets = [0, 0, 0, 0, 0], sizes = [2, 1, 2, 8, 49], strides = [1, 1, 1, 1, 1]} : vector<2x2x2x8x49xf32> to vector<2x1x2x8x49xf32>
    %41 = vector.shape_cast %40 : vector<2x1x2x8x49xf32> to vector<2x2x8x49xf32>
    %42 = vector.extract_strided_slice %39 {offsets = [0, 1, 0, 0, 0], sizes = [2, 1, 2, 8, 49], strides = [1, 1, 1, 1, 1]} : vector<2x2x2x8x49xf32> to vector<2x1x2x8x49xf32>
    %43 = vector.shape_cast %42 : vector<2x1x2x8x49xf32> to vector<2x2x8x49xf32>
    %44 = arith.maximumf %41, %43 : vector<2x2x8x49xf32>
    %cst_12 = arith.constant 0.000000e+00 : f32
    %45 = vector.broadcast %cst_12 : f32 to vector<2x2x8x49xf32>
    %46 = arith.maximumf %44, %45 : vector<2x2x8x49xf32>
    %47 = vector.extract_strided_slice %46 {offsets = [0, 0, 0, 0], sizes = [1, 1, 8, 49], strides = [1, 1, 1, 1]} : vector<2x2x8x49xf32> to vector<1x1x8x49xf32>
    %48 = vector.shape_cast %47 : vector<1x1x8x49xf32> to vector<8x49xf32>
    %49 = vector.extract_strided_slice %46 {offsets = [0, 1, 0, 0], sizes = [1, 1, 8, 49], strides = [1, 1, 1, 1]} : vector<2x2x8x49xf32> to vector<1x1x8x49xf32>
    %50 = vector.shape_cast %49 : vector<1x1x8x49xf32> to vector<8x49xf32>
    %51 = vector.extract_strided_slice %46 {offsets = [1, 0, 0, 0], sizes = [1, 1, 8, 49], strides = [1, 1, 1, 1]} : vector<2x2x8x49xf32> to vector<1x1x8x49xf32>
    %52 = vector.shape_cast %51 : vector<1x1x8x49xf32> to vector<8x49xf32>
    %53 = vector.extract_strided_slice %46 {offsets = [1, 1, 0, 0], sizes = [1, 1, 8, 49], strides = [1, 1, 1, 1]} : vector<2x2x8x49xf32> to vector<1x1x8x49xf32>
    %54 = vector.shape_cast %53 : vector<1x1x8x49xf32> to vector<8x49xf32>
    %55 = tpu.concatenate %48, %50, %52, %54 in 1 : vector<8x49xf32>, vector<8x49xf32>, vector<8x49xf32>, vector<8x49xf32> -> vector<8x196xf32>
    %56 = arith.truncf %55 : vector<8x196xf32> to vector<8x196xbf16>
    %c0_13 = arith.constant 0 : index
    %c0_14 = arith.constant 0 : index
    %57 = vector.load %arg6[%c0_13, %c0_14] : memref<196x100xbf16, #tpu.memory_space<vmem>>, vector<196x100xbf16>
    %cst_15 = arith.constant dense<0.000000e+00> : vector<8x100xf32>
    %58 = tpu.matmul %56, %57, %cst_15 {dimension_numbers = #tpu.dot_dimension_numbers<[1], [0], [0], [1], [0, 0, 1, 1], [], []>} : vector<8x196xbf16>, vector<196x100xbf16>, vector<8x100xf32> -> vector<8x100xf32>
    %c0_16 = arith.constant 0 : index
    %c0_17 = arith.constant 0 : index
    %59 = vector.load %arg7[%c0_16, %c0_17] : memref<1x100xf32, #tpu.memory_space<vmem>>, vector<1x100xf32>
    %60 = vector.broadcast %59 : vector<1x100xf32> to vector<8x100xf32>
    %61 = arith.addf %58, %60 : vector<8x100xf32>
    %cst_18 = arith.constant 0.000000e+00 : f32
    %62 = vector.broadcast %cst_18 : f32 to vector<8x100xf32>
    %63 = arith.maximumf %61, %62 : vector<8x100xf32>
    %c0_19 = arith.constant 0 : index
    %c0_20 = arith.constant 0 : index
    %64 = vector.load %arg8[%c0_19, %c0_20] : memref<1x100xf32, #tpu.memory_space<vmem>>, vector<1x100xf32>
    %65 = vector.broadcast %64 : vector<1x100xf32> to vector<8x100xf32>
    %66 = arith.mulf %63, %65 : vector<8x100xf32>
    %cst_21 = arith.constant dense<0.000000e+00> : vector<8xf32>
    %67 = vector.multi_reduction <add>, %66, %cst_21 [1] : vector<8x100xf32> to vector<8xf32>
    %68 = vector.shape_cast %67 : vector<8xf32> to vector<8x1xf32>
    %c0_22 = arith.constant 0 : index
    %c0_23 = arith.constant 0 : index
    %69 = vector.load %arg9[%c0_22, %c0_23] : memref<1x1xf32, #tpu.memory_space<vmem>>, vector<1x1xf32>
    %70 = vector.broadcast %69 : vector<1x1xf32> to vector<8x1xf32>
    %71 = arith.addf %68, %70 : vector<8x1xf32>
    %cst_24 = arith.constant 0.000000e+00 : f32
    %72 = vector.broadcast %cst_24 : f32 to vector<8x1xf32>
    %73 = arith.maximumf %71, %72 : vector<8x1xf32>
    %cst_25 = arith.constant 0.000000e+00 : f32
    %74 = vector.broadcast %cst_25 : f32 to vector<8x1xf32>
    %75 = arith.subf %74, %73 : vector<8x1xf32>
    %76 = math.exp %75 : vector<8x1xf32>
    %cst_26 = arith.constant 1.000000e+00 : f32
    %77 = vector.broadcast %cst_26 : f32 to vector<8x1xf32>
    %78 = arith.addf %77, %76 : vector<8x1xf32>
    %79 = tpu.reciprocal %78 : vector<8x1xf32> -> vector<8x1xf32>
    %80 = vector.shape_cast %79 : vector<8x1xf32> to vector<1x8xf32>
    %c0_27 = arith.constant 0 : index
    %c0_28 = arith.constant 0 : index
    %81 = vector.load %arg10[%c0_27, %c0_28] : memref<1x8xf32, #tpu.memory_space<vmem>>, vector<1x8xf32>
    tpu.vector_store %arg10[%c0_27, %c0_28], %80 {strides = array<i32>} : memref<1x8xf32, #tpu.memory_space<vmem>>, vector<1x8xf32>,
    return
  }
  func.func @transform_0(%arg0: i32) -> (i32, i32, i32) {
    %c0_i32 = arith.constant 0 : i32
    %c0_i32_0 = arith.constant 0 : i32
    %c0_i32_1 = arith.constant 0 : i32
    return %c0_i32, %arg0, %c0_i32_0 : i32, i32, i32
  }
  func.func @transform_1(%arg0: i32) -> (i32, i32) {
    %c0_i32 = arith.constant 0 : i32
    %c0_i32_0 = arith.constant 0 : i32
    %c0_i32_1 = arith.constant 0 : i32
    return %c0_i32, %c0_i32_0 : i32, i32
  }
  func.func @transform_2(%arg0: i32) -> (i32, i32) {
    %c0_i32 = arith.constant 0 : i32
    %c0_i32_0 = arith.constant 0 : i32
    %c0_i32_1 = arith.constant 0 : i32
    return %c0_i32, %c0_i32_0 : i32, i32
  }
  func.func @transform_3(%arg0: i32) -> (i32, i32) {
    %c0_i32 = arith.constant 0 : i32
    %c0_i32_0 = arith.constant 0 : i32
    %c0_i32_1 = arith.constant 0 : i32
    return %c0_i32, %c0_i32_0 : i32, i32
  }
  func.func @transform_4(%arg0: i32) -> (i32, i32) {
    %c0_i32 = arith.constant 0 : i32
    %c0_i32_0 = arith.constant 0 : i32
    %c0_i32_1 = arith.constant 0 : i32
    return %c0_i32, %c0_i32_0 : i32, i32
  }
  func.func @transform_5(%arg0: i32) -> (i32, i32) {
    %c0_i32 = arith.constant 0 : i32
    %c0_i32_0 = arith.constant 0 : i32
    %c0_i32_1 = arith.constant 0 : i32
    return %c0_i32, %c0_i32_0 : i32, i32
  }
  func.func @transform_6(%arg0: i32) -> (i32, i32) {
    %c0_i32 = arith.constant 0 : i32
    %c0_i32_0 = arith.constant 0 : i32
    %c0_i32_1 = arith.constant 0 : i32
    return %c0_i32, %c0_i32_0 : i32, i32
  }
  func.func @transform_7(%arg0: i32) -> (i32, i32) {
    %c0_i32 = arith.constant 0 : i32
    %c0_i32_0 = arith.constant 0 : i32
    %c0_i32_1 = arith.constant 0 : i32
    return %c0_i32, %c0_i32_0 : i32, i32
  }
  func.func @transform_8(%arg0: i32) -> (i32, i32) {
    %c0_i32 = arith.constant 0 : i32
    %c0_i32_0 = arith.constant 0 : i32
    %c0_i32_1 = arith.constant 0 : i32
    return %c0_i32, %c0_i32_0 : i32, i32
  }
  func.func @transform_9(%arg0: i32) -> (i32, i32) {
    %c0_i32 = arith.constant 0 : i32
    %c0_i32_0 = arith.constant 0 : i32
    return %arg0, %c0_i32 : i32, i32
  }
}

</mosaic_0001>

<bundles_post_ra>
// kernel: wosn_forward.1
= control target key start
LH: loop header
LB: loop body
LE: loop exit
PB: predicated region body
PF: predicated region fallthrough
CT: control target
= control target key end

     0   :  { %vm571_vm0 = vcmask 1040384   ;;  %vm420_vm1 = vcmask 408576   ;;  %s2267_s30 = smov 64   ;;  %vm1253_vm2 = vcmask 261120   ;;  %vm1302_vm3 = vcmask 523264   ;;  %s2269_s20 = smov 49   ;;  %s3026_s1 = inlined_call_operand.vmem [shape: bf16[50,32], index: 1, kind: input, shape index: {}]   ;;  %s3027_s0 = inlined_call_operand.vmem [shape: bf16[100,8,50], index: 0, kind: input, shape index: {}]   ;;  %s3028_s2 = inlined_call_operand.vmem [shape: f32[1,32], index: 2, kind: input, shape index: {}]   ;;  %s3029_s3 = inlined_call_operand.vmem [shape: bf16[128,49], index: 3, kind: input, shape index: {}]   ;;  %s3030_s5 = inlined_call_operand.vmem [shape: bf16[196,100], index: 5, kind: input, shape index: {}]   ;;  %s3031_s4 = inlined_call_operand.vmem [shape: f32[1,49], index: 4, kind: input, shape index: {}]   ;;  %s3032_s8 = inlined_call_operand.<no memory space> [shape: f32[1,1], index: 8, kind: input, shape index: {}]   ;;  %s3033_s6 = inlined_call_operand.vmem [shape: f32[1,100], index: 6, kind: input, shape index: {}]   ;;  %s3034_s7 = inlined_call_operand.vmem [shape: f32[1,100], index: 7, kind: input, shape index: {}]   ;;  %s3035_s9 = inlined_call_operand.vmem [shape: f32[1,8], index: 9, kind: output, shape index: {}]  }
   0x1   :  { %v2186_v0 = vld [vmem:[%s3026_s1 + $0x18] ss:$0 sps:$4 sm:$0x11]   ;;  %v2187_v1 = vld [vmem:[%s3026_s1 + $0x10] sm:$0xff]   ;;  %v2188_v3 = vld [vmem:[%s3026_s1 + $0x8] sm:$0xff]   ;;  %vm1335_vm4 = vcmask 785408  }
   0x2   :  { %2176 = vmatprep.subr.msk.bf16.mxu0 %vm571_vm0, %v2186_v0  ;;  %2177 = vmatprep.subr.msk.bf16.mxu1 %vm571_vm0, %v2186_v0  ;;  %v573_v2 = vsel %vm571_vm0, %v2186_v0, 0  ;;  %v2190_v4 = vld [vmem:[%s3027_s0] sm:$0xff]   ;;  %v2191_v5 = vld [vmem:[%s3027_s0 + $0x110] sm:$0xff]   ;;  %v2192_v7 = vld [vmem:[%s3027_s0 + $0x8] sm:$0xff]   ;;  %vm1731_vm5 = vcmask 1041408   ;;  %s2271_s27 = smov 98  }
   0x3   :  { %2029 = vmatpush3.bf16.msra.mxu0 %v573_v2  ;;  %2172 = vmatpush3.bf16.msra.mxu1 %v573_v2  ;;  %v2189_v6 = vld [vmem:[%s3026_s1] sm:$0xff]   ;;  %v2193_v8 = vld [vmem:[%s3027_s0 + $0x118] sm:$0xff]   ;;  %v2194_v9 = vld [vmem:[%s3027_s0 + $0x10] sm:$0xff]   ;;  %vm1612_vm6 = vcmask 400384   ;;  %vm1614_vm7 = vcmask 801792   ;;  %vm1616_vm8 = vcmask 154624  }
   0x4   :  { %2030 = vmatprep.subr.bf16.mxu0 %v2187_v1  ;;  %2169 = vmatprep.subr.bf16.mxu1 %v2187_v1  ;;  %v2195_v10 = vld [vmem:[%s3027_s0 + $0x120] sm:$0xff]   ;;  %v2196_v11 = vld [vmem:[%s3027_s0 + $0x18] sm:$0xff]   ;;  %v2197_v12 = vld [vmem:[%s3027_s0 + $0x128] sm:$0xff]   ;;  %vm1727_vm9 = vcmask 556032   ;;  %vm1784_vm10 = vcmask 818176   ;;  %vm1813_vm11 = vcmask 57344  }
   0x5   :  { %2036 = vmatprep.mubr.msk.bf16.mxu0 %vm420_vm1, %v2190_v4  ;;  %2104 = vmatprep.mubr.msk.bf16.mxu1 %vm420_vm1, %v2191_v5  ;;  %v2198_v13 = vld [vmem:[%s3027_s0 + $0x20] sm:$0xff]   ;;  %v2199_v14 = vld [vmem:[%s3027_s0 + $0x130] sm:$0xff]   ;;  %v2200_v15 = vld [vmem:[%s3027_s0 + $0x28] sm:$0xff]  }
   0x6   :  { %v2201_v16 = vld [vmem:[%s3027_s0 + $0x138] sm:$0xff]   ;;  %v2202_v17 = vld [vmem:[%s3027_s0 + $0x30] sm:$0xff]   ;;  %v2203_v18 = vld [vmem:[%s3027_s0 + $0x140] sm:$0xff]  }
   0x7   :  { %2031 = vmatpush3.bf16.msra.mxu0 %v2187_v1  ;;  %2173 = vmatpush3.bf16.msra.mxu1 %v2187_v1  ;;  %v2204_v19 = vld [vmem:[%s3027_s0 + $0x38] sm:$0xff]   ;;  %v2205_v20 = vld [vmem:[%s3027_s0 + $0x148] sm:$0xff]   ;;  %v2206_v21 = vld [vmem:[%s3027_s0 + $0x40] sm:$0xff]  }
   0x8   :  { %2032 = vmatprep.subr.bf16.mxu0 %v2188_v3  ;;  %2170 = vmatprep.subr.bf16.mxu1 %v2188_v3  ;;  %v2207_v22 = vld [vmem:[%s3027_s0 + $0x150] sm:$0xff]   ;;  %v2208_v23 = vld [vmem:[%s3027_s0 + $0x48] sm:$0xff]   ;;  %v2209_v24 = vld [vmem:[%s3027_s0 + $0x158] sm:$0xff]  }
   0x9   :  { %v2210_v25 = vld [vmem:[%s3027_s0 + $0x50] sm:$0xff]   ;;  %v2211_v26 = vld [vmem:[%s3027_s0 + $0x160] sm:$0xff]   ;;  %v2212_v27 = vld [vmem:[%s3027_s0 + $0x58] sm:$0xff]  }
   0xa   :  { %v2213_v28 = vld [vmem:[%s3027_s0 + $0x168] sm:$0xff]   ;;  %v2214_v29 = vld [vmem:[%s3027_s0 + $0x60] sm:$0xff]   ;;  %v2215_v30 = vld [vmem:[%s3027_s0 + $0x170] sm:$0xff]  }
   0xb   :  { %2033 = vmatpush3.bf16.msra.mxu0 %v2188_v3  ;;  %2174 = vmatpush3.bf16.msra.mxu1 %v2188_v3  ;;  %v2216_v31 = vld [vmem:[%s3027_s0 + $0x68] sm:$0xff]   ;;  %v2217_v32 = vld [vmem:[%s3027_s0 + $0x178] sm:$0xff]   ;;  %v2218_v33 = vld [vmem:[%s3027_s0 + $0x70] sm:$0xff]  }
   0xc   :  { %2034 = vmatprep.subr.bf16.mxu0 %v2189_v6  ;;  %2171 = vmatprep.subr.bf16.mxu1 %v2189_v6  ;;  %v2219_v34 = vld [vmem:[%s3027_s0 + $0x180] sm:$0xff]   ;;  %v2220_v35 = vld [vmem:[%s3027_s0 + $0x78] sm:$0xff]   ;;  %v2221_v36 = vld [vmem:[%s3027_s0 + $0x188] sm:$0xff]  }
   0xd   :  { %v2222_v37 = vld [vmem:[%s3027_s0 + $0x80] sm:$0xff]   ;;  %v2223_v38 = vld [vmem:[%s3027_s0 + $0x88] sm:$0xff]   ;;  %v2224_v39 = vld [vmem:[%s3027_s0 + $0x90] sm:$0xff]  }
   0xe   :  { %v2225_v40 = vld [vmem:[%s3027_s0 + $0x98] sm:$0xff]   ;;  %v2226_v41 = vld [vmem:[%s3027_s0 + $0xa0] sm:$0xff]   ;;  %v2227_v42 = vld [vmem:[%s3027_s0 + $0xa8] sm:$0xff]  }
   0xf   :  { %2035 = vmatpush3.bf16.msra.mxu0 %v2189_v6  ;;  %2175 = vmatpush3.bf16.msra.mxu1 %v2189_v6  ;;  %v2228_v43 = vld [vmem:[%s3027_s0 + $0xb0] sm:$0xff]   ;;  %v2229_v44 = vld [vmem:[%s3027_s0 + $0xb8] sm:$0xff]   ;;  %v2230_v45 = vld [vmem:[%s3027_s0 + $0xc0] sm:$0xff]  }
  0x10   :  { %v2231_v46 = vld [vmem:[%s3027_s0 + $0xc8] sm:$0xff]   ;;  %v2232_v47 = vld [vmem:[%s3027_s0 + $0xd0] sm:$0xff]   ;;  %v2233_v48 = vld [vmem:[%s3027_s0 + $0xd8] sm:$0xff]  }
  0x11   :  { %v2234_v49 = vld [vmem:[%s3027_s0 + $0xe0] sm:$0xff]   ;;  %v2235_v50 = vld [vmem:[%s3027_s0 + $0xe8] sm:$0xff]   ;;  %v2236_v51 = vld [vmem:[%s3027_s0 + $0xf0] sm:$0xff]  }
  0x12   :  { %2037 = vmatmul.mubr.msk.bf16.vlgmr.msra.gmra.mxu0 %vm420_vm1, %v2192_v7  ;;  %2105 = vmatmul.mubr.msk.bf16.vlgmr.msra.gmra.mxu1 %vm420_vm1, %v2193_v8  ;;  %v2237_v52 = vld [vmem:[%s3027_s0 + $0xf8] sm:$0xff]   ;;  %v2238_v53 = vld [vmem:[%s3027_s0 + $0x100] sm:$0xff]   ;;  %v2239_v54 = vld [vmem:[%s3027_s0 + $0x108] sm:$0xff]   ;;  %s2265_s0 = smov 96  }
  0x13   :  { %2040 = vmatprep.mubr.msk.bf16.mxu0 %vm420_vm1, %v2194_v9  ;;  %2108 = vmatprep.mubr.msk.bf16.mxu1 %vm420_vm1, %v2195_v10  ;;  %v2539_v57 = vld [vmem:[%s3028_s2] ss:$0 sm:$0xff]  ;;  %s2266_s2 = smov 32  }
  0x1a   :  { %2041 = vmatmul.mubr.msk.bf16.gmra.mxu0 %vm420_vm1, %v2196_v11  ;;  %2109 = vmatmul.mubr.msk.bf16.gmra.mxu1 %vm420_vm1, %v2197_v12 }
  0x1b   :  { %2044 = vmatprep.mubr.msk.bf16.mxu0 %vm420_vm1, %v2198_v13  ;;  %2112 = vmatprep.mubr.msk.bf16.mxu1 %vm420_vm1, %v2199_v14 }
  0x22   :  { %2045 = vmatmul.mubr.msk.bf16.gmra.mxu0 %vm420_vm1, %v2200_v15  ;;  %2113 = vmatmul.mubr.msk.bf16.gmra.mxu1 %vm420_vm1, %v2201_v16 }
  0x23   :  { %2048 = vmatprep.mubr.msk.bf16.mxu0 %vm420_vm1, %v2202_v17  ;;  %2116 = vmatprep.mubr.msk.bf16.mxu1 %vm420_vm1, %v2203_v18 }
  0x2a   :  { %2049 = vmatmul.mubr.msk.bf16.gmra.mxu0 %vm420_vm1, %v2204_v19  ;;  %2117 = vmatmul.mubr.msk.bf16.gmra.mxu1 %vm420_vm1, %v2205_v20 }
  0x2b   :  { %2052 = vmatprep.mubr.msk.bf16.mxu0 %vm420_vm1, %v2206_v21  ;;  %2120 = vmatprep.mubr.msk.bf16.mxu1 %vm420_vm1, %v2207_v22 }
  0x32   :  { %2053 = vmatmul.mubr.msk.bf16.gmra.mxu0 %vm420_vm1, %v2208_v23  ;;  %2121 = vmatmul.mubr.msk.bf16.gmra.mxu1 %vm420_vm1, %v2209_v24 }
  0x33   :  { %2056 = vmatprep.mubr.msk.bf16.mxu0 %vm420_vm1, %v2210_v25  ;;  %2124 = vmatprep.mubr.msk.bf16.mxu1 %vm420_vm1, %v2211_v26 }
  0x3a   :  { %2057 = vmatmul.mubr.msk.bf16.gmra.mxu0 %vm420_vm1, %v2212_v27  ;;  %2125 = vmatmul.mubr.msk.bf16.gmra.mxu1 %vm420_vm1, %v2213_v28 }
  0x3b   :  { %2060 = vmatprep.mubr.msk.bf16.mxu0 %vm420_vm1, %v2214_v29  ;;  %2128 = vmatprep.mubr.msk.bf16.mxu1 %vm420_vm1, %v2215_v30 }
  0x42   :  { %2061 = vmatmul.mubr.msk.bf16.gmra.mxu0 %vm420_vm1, %v2216_v31  ;;  %2129 = vmatmul.mubr.msk.bf16.gmra.mxu1 %vm420_vm1, %v2217_v32 }
  0x43   :  { %2064 = vmatprep.mubr.msk.bf16.mxu0 %vm420_vm1, %v2218_v33  ;;  %2132 = vmatprep.mubr.msk.bf16.mxu1 %vm420_vm1, %v2219_v34 }
  0x4a   :  { %2065 = vmatmul.mubr.msk.bf16.gmra.mxu0 %vm420_vm1, %v2220_v35  ;;  %2133 = vmatmul.mubr.msk.bf16.gmra.mxu1 %vm420_vm1, %v2221_v36 }
  0x4b   :  { %2068 = vmatprep.mubr.msk.bf16.mxu0 %vm420_vm1, %v2222_v37 }
  0x52   :  { %2069 = vmatmul.mubr.msk.bf16.gmra.mxu0 %vm420_vm1, %v2223_v38 }
  0x53   :  { %2072 = vmatprep.mubr.msk.bf16.mxu0 %vm420_vm1, %v2224_v39 }
  0x5a   :  { %2073 = vmatmul.mubr.msk.bf16.gmra.mxu0 %vm420_vm1, %v2225_v40 }
  0x5b   :  { %2076 = vmatprep.mubr.msk.bf16.mxu0 %vm420_vm1, %v2226_v41 }
  0x62   :  { %2077 = vmatmul.mubr.msk.bf16.gmra.mxu0 %vm420_vm1, %v2227_v42 }
  0x63   :  { %2080 = vmatprep.mubr.msk.bf16.mxu0 %vm420_vm1, %v2228_v43 }
  0x6a   :  { %2081 = vmatmul.mubr.msk.bf16.gmra.mxu0 %vm420_vm1, %v2229_v44 }
  0x6b   :  { %2084 = vmatprep.mubr.msk.bf16.mxu0 %vm420_vm1, %v2230_v45 }
  0x72   :  { %2085 = vmatmul.mubr.msk.bf16.gmra.mxu0 %vm420_vm1, %v2231_v46 }
  0x73   :  { %2088 = vmatprep.mubr.msk.bf16.mxu0 %vm420_vm1, %v2232_v47 }
  0x7a   :  { %2089 = vmatmul.mubr.msk.bf16.gmra.mxu0 %vm420_vm1, %v2233_v48 }
  0x7b   :  { %2092 = vmatprep.mubr.msk.bf16.mxu0 %vm420_vm1, %v2234_v49 }
  0x82   :  { %2093 = vmatmul.mubr.msk.bf16.gmra.mxu0 %vm420_vm1, %v2235_v50 }
  0x83   :  { %2096 = vmatprep.mubr.msk.bf16.mxu0 %vm420_vm1, %v2236_v51 }
  0x8a   :  { %2097 = vmatmul.mubr.msk.bf16.gmra.mxu0 %vm420_vm1, %v2237_v52 }
  0x8b   :  { %2100 = vmatprep.mubr.msk.bf16.mxu0 %vm420_vm1, %v2238_v53 }
  0x92   :  { %2101 = vmatmul.mubr.msk.bf16.gmra.mxu0 %vm420_vm1, %v2239_v54 }
  0xd2   :  { %v2534_v55 = vpop.f32.mrf.mxu0  ;;  %v2106_v56 = vpop.f32.mrf.mxu1 }
  0xd3   :  { %v2542_v60 = vadd.f32 %v2106_v56, %v2539_v57 }
  0xd4   :  { %v609_v58 = vpop.f32.mrf.mxu0  ;;  %v881_v59 = vpop.f32.mrf.mxu1 }
  0xd5   :  { %v610_v2 = vadd.f32 %v2539_v57, %v609_v58  ;;  %v882_v22 = vadd.f32 %v2539_v57, %v881_v59  ;;  %v618_v59 = vadd.f32 %v2534_v55, %v2539_v57 }
  0xd6   :  { %v2039_v61 = vpop.f32.mrf.mxu0  ;;  %v2107_v62 = vpop.f32.mrf.mxu1 }
  0xd7   :  { %v2545_v63 = vadd.f32 %v2107_v62, %v2539_v57  ;;  %v621_v50 = vadd.f32 %v2039_v61, %v2539_v57 }
  0xd8   :  { %v612_v0 = vpop.f32.mrf.mxu0  ;;  %v884_v1 = vpop.f32.mrf.mxu1 }
  0xd9   :  { %v1043_v3 = vmax.f32 %v2542_v60, %v2545_v63  ;;  %v613_v4 = vadd.f32 %v2539_v57, %v612_v0  ;;  %v885_v23 = vadd.f32 %v2539_v57, %v884_v1 }
  0xda   :  { %v2551_v5 = vpop.f32.mrf.mxu0  ;;  %v2110_v6 = vpop.f32.mrf.mxu1 }
  0xdb   :  { %v1008_v7 = vmax.f32 %v610_v2, %v613_v4  ;;  %v2554_v10 = vadd.f32 %v2110_v6, %v2539_v57  ;;  %v1042_v33 = vmax.f32 %v882_v22, %v885_v23  ;;  %v1009_v6 = vmax.f32 %v618_v59, %v621_v50 }
  0xdc   :  { %v625_v8 = vpop.f32.mrf.mxu0  ;;  %v897_v9 = vpop.f32.mrf.mxu1 }
  0xdd   :  { %v2559_v13 = vadd.f32 %v2539_v57, %v897_v9  ;;  %v626_v53 = vadd.f32 %v2539_v57, %v625_v8 }
  0xde   :  { %v2556_v11 = vpop.f32.mrf.mxu0  ;;  %v2111_v12 = vpop.f32.mrf.mxu1 }
  0xdf   :  { %v2562_v14 = vadd.f32 %v2111_v12, %v2539_v57 }
  0xe0   :  { %v628_v15 = vpop.f32.mrf.mxu0  ;;  %v900_v16 = vpop.f32.mrf.mxu1 }
  0xe1   :  { %v1045_v17 = vmax.f32 %v2554_v10, %v2562_v14  ;;  %v2567_v18 = vadd.f32 %v2539_v57, %v900_v16  ;;  %v629_v46 = vadd.f32 %v2539_v57, %v628_v15 }
  0xe2   :  { %v2046_v19 = vpop.f32.mrf.mxu0  ;;  %v2114_v20 = vpop.f32.mrf.mxu1 }
  0xe3   :  { %v1044_v21 = vmax.f32 %v2559_v13, %v2567_v18  ;;  %v922_v26 = vadd.f32 %v2114_v20, %v2539_v57  ;;  %v650_v29 = vadd.f32 %v2046_v19, %v2539_v57  ;;  %v1010_v2 = vmax.f32 %v626_v53, %v629_v46 }
  0xe4   :  { %v641_v24 = vpop.f32.mrf.mxu0  ;;  %v913_v25 = vpop.f32.mrf.mxu1  ;;  %v634_v19 = vadd.f32 %v2551_v5, %v2539_v57  ;;  %v637_v20 = vadd.f32 %v2556_v11, %v2539_v57 }
  0xe5   :  { %v2576_v30 = vadd.f32 %v2539_v57, %v913_v25  ;;  %v642_v22 = vadd.f32 %v2539_v57, %v641_v24 }
  0xe6   :  { %v2047_v27 = vpop.f32.mrf.mxu0  ;;  %v2115_v28 = vpop.f32.mrf.mxu1 }
  0xe7   :  { %v653_v31 = vadd.f32 %v2047_v27, %v2539_v57  ;;  %v925_v32 = vadd.f32 %v2115_v28, %v2539_v57 }
  0xe8   :  { %v644_v34 = vpop.f32.mrf.mxu0  ;;  %v916_v35 = vpop.f32.mrf.mxu1 }
  0xe9   :  { %v1013_v36 = vmax.f32 %v650_v29, %v653_v31  ;;  %v1047_v37 = vmax.f32 %v922_v26, %v925_v32  ;;  %v2581_v38 = vadd.f32 %v2539_v57, %v916_v35  ;;  %v645_v8 = vadd.f32 %v2539_v57, %v644_v34 }
  0xea   :  { %v2050_v39 = vpop.f32.mrf.mxu0  ;;  %v2583_v40 = vpop.f32.mrf.mxu1 }
  0xeb   :  { %v2585_v41 = vmax.f32 %v1008_v7, %v1013_v36  ;;  %v1046_v42 = vmax.f32 %v2576_v30, %v2581_v38  ;;  %v1077_v45 = vmax.f32 %v1042_v33, %v1047_v37  ;;  %v666_v51 = vadd.f32 %v2050_v39, %v2539_v57 }
  0xec   :  { %v657_v43 = vpop.f32.mrf.mxu0  ;;  %v929_v44 = vpop.f32.mrf.mxu1  ;;  %v1012_v31 = vmax.f32 %v642_v22, %v645_v8 }
  0xed   :  { %v1102_v49 = vmax.f32 %v1077_v45, 0.0  ;;  %v658_v62 = vadd.f32 %v2539_v57, %v657_v43  ;;  %v930_v43 = vadd.f32 %v2539_v57, %v929_v44 }
  0xee   :  { %v2051_v47 = vpop.f32.mrf.mxu0  ;;  %v2590_v48 = vpop.f32.mrf.mxu1 }
  0xef   :  { %v669_v52 = vadd.f32 %v2051_v47, %v2539_v57  ;;  %v1127_v58 = vpack.c.bf16 %v1102_v49, %v1102_v49  ;;  %v1011_v49 = vmax.f32 %v634_v19, %v637_v20 }
  0xf0   :  { %v660_v54 = vpop.f32.mrf.mxu0  ;;  %v932_v56 = vpop.f32.mrf.mxu1 }
  0xf1   :  { %v1015_v0 = vmax.f32 %v666_v51, %v669_v52  ;;  %v661_v1 = vadd.f32 %v2539_v57, %v660_v54  ;;  %1243 = vrot.lane.b32.xlu1 %v1127_v58, %s2265_s0  ;;  %v933_v45 = vadd.f32 %v2539_v57, %v932_v56 }
  0xf2   :  { %v2054_v61 = vpop.f32.mrf.mxu0  ;;  %v2122_v4 = vpop.f32.mrf.mxu1 }
  0xf3   :  { %v1014_v7 = vmax.f32 %v658_v62, %v661_v1  ;;  %v1060_v15 = vmax.f32 %v1010_v2, %v1015_v0  ;;  %v2603_v55 = vadd.f32 %v2122_v4, %v2539_v57  ;;  %v682_v27 = vadd.f32 %v2054_v61, %v2539_v57 }
  0xf4   :  { %v673_v9 = vpop.f32.mrf.mxu0  ;;  %v945_v12 = vpop.f32.mrf.mxu1  ;;  %v1048_v56 = vmax.f32 %v930_v43, %v933_v45 }
  0xf5   :  { %v1059_v16 = vmax.f32 %v1009_v6, %v1014_v7  ;;  %1179 = vrot.lane.b32.xlu1 %v1127_v58, %s2266_s2  ;;  %v1085_v26 = vmax.f32 %v1060_v15, 0.0  ;;  %v2613_v28 = vadd.f32 %v2539_v57, %v945_v12  ;;  %v674_v11 = vadd.f32 %v2539_v57, %v673_v9 }
  0xf6   :  { %v2055_v23 = vpop.f32.mrf.mxu0  ;;  %v2123_v25 = vpop.f32.mrf.mxu1 }
  0xf7   :  { %v685_v29 = vadd.f32 %v2055_v23, %v2539_v57  ;;  %v2617_v5 = vadd.f32 %v2123_v25, %v2539_v57  ;;  %v2620_v33 = vpack.c.bf16 %v1085_v26, %v1085_v26  ;;  %v1084_v34 = vmax.f32 %v1059_v16, 0.0 }
  0xf8   :  { %v676_v24 = vpop.f32.mrf.mxu0  ;;  %v948_v32 = vpop.f32.mrf.mxu1  ;;  %v938_v26 = vadd.f32 %v2583_v40, %v2539_v57 }
  0xf9   :  { %v1017_v35 = vmax.f32 %v682_v27, %v685_v29  ;;  %v1051_v36 = vmax.f32 %v2603_v55, %v2617_v5  ;;  %v677_v37 = vadd.f32 %v2539_v57, %v676_v24  ;;  %v949_v39 = vadd.f32 %v2539_v57, %v948_v32  ;;  %1151 = vrot.lane.b32.xlu0 %v2620_v33, %s2266_s2 }
  0xfa   :  { %v2630_v46 = vpop.f32.mrf.mxu0  ;;  %v2126_v47 = vpop.f32.mrf.mxu1  ;;  %v2633_v58 = vpack.c.bf16 %v1084_v34, %v1084_v34  ;;  %v941_v27 = vadd.f32 %v2590_v48, %v2539_v57 }
  0xfb   :  { %v1062_v50 = vmax.f32 %v1012_v31, %v1017_v35  ;;  %v1016_v51 = vmax.f32 %v674_v11, %v677_v37  ;;  %v1050_v52 = vmax.f32 %v2613_v28, %v949_v39  ;;  %v970_v44 = vadd.f32 %v2126_v47, %v2539_v57 }
  0xfc   :  { %v689_v53 = vpop.f32.mrf.mxu0  ;;  %v961_v54 = vpop.f32.mrf.mxu1  ;;  %v1049_v40 = vmax.f32 %v938_v26, %v941_v27 }
  0xfd   :  { %v1061_v59 = vmax.f32 %v1011_v49, %v1016_v51  ;;  %v1087_v62 = vmax.f32 %v1062_v50, 0.0  ;;  %1149 = vrot.lane.b32.xlu0 %v2633_v58, %s2266_s2  ;;  %v2641_v2 = vadd.f32 %v2539_v57, %v961_v54  ;;  %v2240_v49 = vld [vmem:[%s3029_s3 + $0x38] sm:$0xff]   ;;  %v2241_v51 = vld [vmem:[%s3029_s3 + $0x30] sm:$0xff]  }
  0xfe   :  { %v2638_v0 = vpop.f32.mrf.mxu0  ;;  %v2127_v1 = vpop.f32.mrf.mxu1  ;;  %2136 = vmatprep.subr.bf16.mxu1 %v2240_v49 }
  0xff   :  { %v973_v61 = vadd.f32 %v2127_v1, %v2539_v57  ;;  %v1112_v4 = vpack.c.bf16 %v1087_v62, %v1087_v62  ;;  %v1086_v6 = vmax.f32 %v1061_v59, 0.0  ;;  %2137 = vmatpush3.bf16.msra.mxu1 %v2240_v49  ;;  %v690_v62 = vadd.f32 %v2539_v57, %v689_v53 }
 0x100   :  { %v692_v7 = vpop.f32.mrf.mxu0  ;;  %v964_v8 = vpop.f32.mrf.mxu1  ;;  %2138 = vmatprep.subr.bf16.mxu1 %v2241_v51 }
 0x101   :  { %v1053_v9 = vmax.f32 %v970_v44, %v973_v61  ;;  %v2645_v12 = vadd.f32 %v2539_v57, %v964_v8  ;;  %1155 = vrot.lane.b32.xlu1 %v1112_v4, %s2266_s2  ;;  %v2652_v22 = vpack.c.bf16 %v1086_v6, %v1086_v6  ;;  %v693_v54 = vadd.f32 %v2539_v57, %v692_v7 }
 0x102   :  { %v2648_v15 = vpop.f32.mrf.mxu0  ;;  %v2130_v16 = vpop.f32.mrf.mxu1 }
 0x103   :  { %v1078_v19 = vmax.f32 %v1048_v56, %v1053_v9  ;;  %v1052_v20 = vmax.f32 %v2641_v2, %v2645_v12  ;;  %v986_v28 = vadd.f32 %v2130_v16, %v2539_v57  ;;  %v1018_v4 = vmax.f32 %v690_v62, %v693_v54  ;;  %2139 = vmatpush3.bf16.msra.mxu1 %v2241_v51  ;;  %v2242_v16 = vld [vmem:[%s3029_s3 + $0x28] sm:$0xff]  }
 0x104   :  { %v705_v23 = vpop.f32.mrf.mxu0  ;;  %v977_v25 = vpop.f32.mrf.mxu1  ;;  %2140 = vmatprep.subr.bf16.mxu1 %v2242_v16 }
 0x105   :  { %1153 = vrot.lane.b32.xlu1 %v2652_v22, %s2266_s2  ;;  %v1103_v29 = vmax.f32 %v1078_v19, 0.0  ;;  %v978_v24 = vadd.f32 %v2539_v57, %v977_v25  ;;  %v706_v26 = vadd.f32 %v2539_v57, %v705_v23 }
 0x106   :  { %v2661_v31 = vpop.f32.mrf.mxu0  ;;  %v2131_v11 = vpop.f32.mrf.mxu1 }
 0x107   :  { %v989_v32 = vadd.f32 %v2131_v11, %v2539_v57  ;;  %v1128_v34 = vpack.c.bf16 %v1103_v29, %v1103_v29  ;;  %2141 = vmatpush3.bf16.msra.mxu1 %v2242_v16 }
 0x108   :  { %v708_v35 = vpop.f32.mrf.mxu0  ;;  %v980_v37 = vpop.f32.mrf.mxu1 }
 0x109   :  { %v1055_v39 = vmax.f32 %v986_v28, %v989_v32  ;;  %v981_v48 = vadd.f32 %v2539_v57, %v980_v37  ;;  %1212 = vrot.lane.b32.xlu0 %v1128_v34, %s2267_s30  ;;  %v709_v53 = vadd.f32 %v2539_v57, %v708_v35  ;;  %v701_v28 = vadd.f32 %v2638_v0, %v2539_v57  ;;  %v2243_v32 = vld [vmem:[%s3029_s3 + $0x20] sm:$0xff]  }
 0x10a   :  { %v2066_v43 = vpop.f32.mrf.mxu0  ;;  %v698_v34 = vadd.f32 %v2630_v46, %v2539_v57  ;;  %2142 = vmatprep.subr.bf16.mxu1 %v2243_v32  ;;  %v2244_v46 = vld [vmem:[%s3029_s3 + $0x18] sm:$0xff]  }
 0x10b   :  { %v2667_v45 = vmax.f32 %v1050_v52, %v1055_v39  ;;  %v1054_v47 = vmax.f32 %v978_v24, %v981_v48  ;;  %v730_v52 = vadd.f32 %v2066_v43, %v2539_v57  ;;  %v1020_v35 = vmax.f32 %v706_v26, %v709_v53  ;;  %2143 = vmatpush3.bf16.msra.mxu1 %v2243_v32 }
 0x10c   :  { %v721_v50 = vpop.f32.mrf.mxu0  ;;  %v1019_v48 = vmax.f32 %v698_v34, %v701_v28  ;;  %2144 = vmatprep.subr.bf16.mxu1 %v2244_v46  ;;  %v2246_v28 = vld [vmem:[%s3029_s3 + $0x8] sm:$0xff]  }
 0x10d   :  { %v1079_v59 = vmax.f32 %v1049_v40, %v1054_v47  ;;  %v722_v62 = vadd.f32 %v2539_v57, %v721_v50 }
 0x10e   :  { %v2067_v44 = vpop.f32.mrf.mxu0 }
 0x10f   :  { %v733_v56 = vadd.f32 %v2067_v44, %v2539_v57  ;;  %v1104_v1 = vmax.f32 %v1079_v59, 0.0  ;;  %v717_v44 = vadd.f32 %v2661_v31, %v2539_v57  ;;  %2145 = vmatpush3.bf16.msra.mxu1 %v2244_v46 }
 0x110   :  { %v724_v61 = vpop.f32.mrf.mxu0 }
 0x111   :  { %v1023_v6 = vmax.f32 %v730_v52, %v733_v56  ;;  %v2679_v9 = vpack.c.bf16 %v1104_v1, %v1104_v1  ;;  %v725_v49 = vadd.f32 %v2539_v57, %v724_v61  ;;  %v2245_v61 = vld [vmem:[%s3029_s3 + $0x10] sm:$0xff]  }
 0x112   :  { %v2070_v8 = vpop.f32.mrf.mxu0  ;;  %2146 = vmatprep.subr.bf16.mxu1 %v2245_v61 }
 0x113   :  { %v1063_v7 = vmax.f32 %v1018_v4, %v1023_v6  ;;  %1214 = vrot.lane.b32.xlu1 %v2679_v9, %s2267_s30  ;;  %v746_v29 = vadd.f32 %v2070_v8, %v2539_v57  ;;  %v714_v8 = vadd.f32 %v2648_v15, %v2539_v57  ;;  %2147 = vmatpush3.bf16.msra.mxu1 %v2245_v61 }
 0x114   :  { %v737_v19 = vpop.f32.mrf.mxu0  ;;  %2148 = vmatprep.subr.bf16.mxu1 %v2246_v28 }
 0x115   :  { %v1088_v25 = vmax.f32 %v1063_v7, 0.0  ;;  %v738_v37 = vadd.f32 %v2539_v57, %v737_v19  ;;  %v1022_v7 = vmax.f32 %v722_v62, %v725_v49 }
 0x116   :  { %v2071_v27 = vpop.f32.mrf.mxu0 }
 0x117   :  { %v749_v11 = vadd.f32 %v2071_v27, %v2539_v57  ;;  %v2692_v24 = vpack.c.bf16 %v1088_v25, %v1088_v25  ;;  %v1021_v25 = vmax.f32 %v714_v8, %v717_v44  ;;  %2149 = vmatpush3.bf16.msra.mxu1 %v2246_v28 }
 0x118   :  { %v740_v23 = vpop.f32.mrf.mxu0 }
 0x119   :  { %v1025_v40 = vmax.f32 %v746_v29, %v749_v11  ;;  %v741_v0 = vadd.f32 %v2539_v57, %v740_v23  ;;  %1188 = vrot.lane.b32.xlu0 %v2692_v24, %s2267_s30  ;;  %v2247_v23 = vld [vmem:[%s3029_s3] sm:$0xff]  }
 0x11a   :  { %v2074_v39 = vpop.f32.mrf.mxu0  ;;  %2150 = vmatprep.subr.bf16.mxu1 %v2247_v23 }
 0x11b   :  { %v1065_v43 = vmax.f32 %v1020_v35, %v1025_v40  ;;  %v1024_v47 = vmax.f32 %v738_v37, %v741_v0  ;;  %v762_v4 = vadd.f32 %v2074_v39, %v2539_v57  ;;  %2151 = vmatpush3.bf16.msra.mxu1 %v2247_v23 }
 0x11c   :  { %v753_v51 = vpop.f32.mrf.mxu0 }
 0x11d   :  { %v1090_v54 = vmax.f32 %v1065_v43, 0.0  ;;  %v1064_v59 = vmax.f32 %v1019_v48, %v1024_v47  ;;  %v754_v50 = vadd.f32 %v2539_v57, %v753_v51 }
 0x11e   :  { %v2075_v52 = vpop.f32.mrf.mxu0 }
 0x11f   :  { %v2710_v56 = vpack.c.bf16 %v1090_v54, %v1090_v54  ;;  %v1089_v1 = vmax.f32 %v1064_v59, 0.0  ;;  %v765_v6 = vadd.f32 %v2075_v52, %v2539_v57 }
 0x120   :  { %v756_v31 = vpop.f32.mrf.mxu0 }
 0x121   :  { %v1027_v16 = vmax.f32 %v762_v4, %v765_v6  ;;  %v757_v53 = vadd.f32 %v2539_v57, %v756_v31  ;;  %1223 = vrot.lane.b32.xlu1 %v2710_v56, %s2265_s0  ;;  %1192 = vrot.lane.b32.xlu0 %v2710_v56, %s2267_s30  ;;  %v2725_v26 = vpack.c.bf16 %v1089_v1, %v1089_v1 }
 0x122   :  { %v2078_v19 = vpop.f32.mrf.mxu0 }
 0x123   :  { %v1067_v27 = vmax.f32 %v1022_v7, %v1027_v16  ;;  %v1026_v15 = vmax.f32 %v754_v50, %v757_v53  ;;  %v778_v28 = vadd.f32 %v2078_v19, %v2539_v57 }
 0x124   :  { %v769_v29 = vpop.f32.mrf.mxu0 }
 0x125   :  { %v1066_v11 = vmax.f32 %v1021_v25, %v1026_v15  ;;  %1159 = vrot.lane.b32.xlu1 %v2710_v56, %s2266_s2  ;;  %1221 = vrot.lane.b32.xlu0 %v2725_v26, %s2265_s0  ;;  %v1092_v35 = vmax.f32 %v1067_v27, 0.0  ;;  %v770_v59 = vadd.f32 %v2539_v57, %v769_v29 }
 0x126   :  { %v2079_v32 = vpop.f32.mrf.mxu0 }
 0x127   :  { %v1091_v34 = vmax.f32 %v1066_v11, 0.0  ;;  %v1117_v39 = vpack.c.bf16 %v1092_v35, %v1092_v35  ;;  %v781_v50 = vadd.f32 %v2079_v32, %v2539_v57 }
 0x128   :  { %v772_v37 = vpop.f32.mrf.mxu0 }
 0x129   :  { %1190 = vrot.lane.b32.xlu1 %v2725_v26, %s2267_s30  ;;  %1157 = vrot.lane.b32.xlu0 %v2725_v26, %s2266_s2  ;;  %v2741_v0 = vpack.c.bf16 %v1091_v34, %v1091_v34  ;;  %v773_v51 = vadd.f32 %v2539_v57, %v772_v37  ;;  %v1029_v37 = vmax.f32 %v778_v28, %v781_v50 }
 0x12a   :  { %v2082_v40 = vpop.f32.mrf.mxu0 }
 0x12b   :  { %v1028_v1 = vmax.f32 %v770_v59, %v773_v51 }
 0x12c   :  { %v785_v48 = vpop.f32.mrf.mxu0 }
 0x12d   :  { %1227 = vrot.lane.b32.xlu1 %v1117_v39, %s2265_s0  ;;  %1225 = vrot.lane.b32.xlu0 %v2741_v0, %s2265_s0  ;;  %v786_v53 = vadd.f32 %v2539_v57, %v785_v48 }
 0x12e   :  { %v2083_v43 = vpop.f32.mrf.mxu0 }
 0x12f   :  { %v797_v19 = vadd.f32 %v2083_v43, %v2539_v57 }
 0x130   :  { %v788_v47 = vpop.f32.mrf.mxu0 }
 0x131   :  { %1163 = vrot.lane.b32.xlu1 %v1117_v39, %s2266_s2  ;;  %1161 = vrot.lane.b32.xlu0 %v2741_v0, %s2266_s2  ;;  %v789_v7 = vadd.f32 %v2539_v57, %v788_v47 }
 0x132   :  { %v2086_v46 = vpop.f32.mrf.mxu0 }
 0x133   :  { %v810_v44 = vadd.f32 %v2086_v46, %v2539_v57  ;;  %v1030_v11 = vmax.f32 %v786_v53, %v789_v7 }
 0x134   :  { %v801_v49 = vpop.f32.mrf.mxu0 }
 0x135   :  { %1194 = vrot.lane.b32.xlu1 %v2741_v0, %s2267_s30  ;;  %v802_v59 = vadd.f32 %v2539_v57, %v801_v49 }
 0x136   :  { %v2087_v54 = vpop.f32.mrf.mxu0 }
 0x137   :  { %v813_v62 = vadd.f32 %v2087_v54, %v2539_v57 }
 0x138   :  { %v804_v52 = vpop.f32.mrf.mxu0 }
 0x139   :  { %v1033_v4 = vmax.f32 %v810_v44, %v813_v62  ;;  %v805_v47 = vadd.f32 %v2539_v57, %v804_v52  ;;  %v2770_v62 = vpop.f32.mrf.mxu1 }
 0x13a   :  { %v2090_v6 = vpop.f32.mrf.mxu0  ;;  %v1002_v55 = vadd.f32 %v2770_v62, %v2539_v57 }
 0x13b   :  { %v1068_v61 = vmax.f32 %v1028_v1, %v1033_v4  ;;  %v826_v25 = vadd.f32 %v2090_v6, %v2539_v57  ;;  %v1032_v52 = vmax.f32 %v802_v59, %v805_v47 }
 0x13c   :  { %v817_v8 = vpop.f32.mrf.mxu0 }
 0x13d   :  { %v1093_v31 = vmax.f32 %v1068_v61, 0.0  ;;  %v818_v34 = vadd.f32 %v2539_v57, %v817_v8  ;;  %v794_v8 = vadd.f32 %v2082_v40, %v2539_v57 }
 0x13e   :  { %v2091_v16 = vpop.f32.mrf.mxu0 }
 0x13f   :  { %v829_v27 = vadd.f32 %v2091_v16, %v2539_v57  ;;  %v2760_v15 = vpack.c.bf16 %v1093_v31, %v1093_v31  ;;  %v993_v16 = vpop.f32.mrf.mxu1  ;;  %v1031_v53 = vmax.f32 %v794_v8, %v797_v19 }
 0x140   :  { %v820_v29 = vpop.f32.mrf.mxu0 }
 0x141   :  { %v1035_v35 = vmax.f32 %v826_v25, %v829_v27  ;;  %v821_v23 = vadd.f32 %v2539_v57, %v820_v29  ;;  %1196 = vrot.lane.b32.xlu0 %v2760_v15, %s2267_s30 }
 0x142   :  { %v2094_v32 = vpop.f32.mrf.mxu0 }
 0x143   :  { %v1070_v39 = vmax.f32 %v1030_v11, %v1035_v35  ;;  %v1034_v48 = vmax.f32 %v818_v34, %v821_v23  ;;  %v842_v6 = vadd.f32 %v2094_v32, %v2539_v57  ;;  %v2135_v35 = vpop.f32.mrf.mxu1 }
 0x144   :  { %v833_v46 = vpop.f32.mrf.mxu0  ;;  %v1005_v5 = vadd.f32 %v2135_v35, %v2539_v57 }
 0x145   :  { %v1095_v51 = vmax.f32 %v1070_v39, 0.0  ;;  %v1069_v54 = vmax.f32 %v1029_v37, %v1034_v48  ;;  %v834_v31 = vadd.f32 %v2539_v57, %v833_v46 }
 0x146   :  { %v2095_v44 = vpop.f32.mrf.mxu0 }
 0x147   :  { %v2772_v1 = vpack.c.bf16 %v1095_v51, %v1095_v51  ;;  %v1094_v4 = vmax.f32 %v1069_v54, 0.0  ;;  %v845_v61 = vadd.f32 %v2095_v44, %v2539_v57  ;;  %v996_v51 = vpop.f32.mrf.mxu1 }
 0x148   :  { %v836_v7 = vpop.f32.mrf.mxu0  ;;  %v997_v8 = vadd.f32 %v2539_v57, %v996_v51  ;;  %v1083_v51 = vmax.f32 %v2585_v41, 0.0 }
 0x149   :  { %v1037_v50 = vmax.f32 %v842_v6, %v845_v61  ;;  %v837_v43 = vadd.f32 %v2539_v57, %v836_v7  ;;  %1231 = vrot.lane.b32.xlu1 %v2772_v1, %s2265_s0  ;;  %1200 = vrot.lane.b32.xlu0 %v2772_v1, %s2267_s30  ;;  %v2783_v25 = vpack.c.bf16 %v1094_v4, %v1094_v4 }
 0x14a   :  { %v2098_v49 = vpop.f32.mrf.mxu0  ;;  %v994_v61 = vadd.f32 %v2539_v57, %v993_v16 }
 0x14b   :  { %v1072_v27 = vmax.f32 %v1032_v52, %v1037_v50  ;;  %v1036_v40 = vmax.f32 %v834_v31, %v837_v43  ;;  %v858_v11 = vadd.f32 %v2098_v49, %v2539_v57 }
 0x14c   :  { %v849_v28 = vpop.f32.mrf.mxu0  ;;  %v1056_v50 = vmax.f32 %v994_v61, %v997_v8 }
 0x14d   :  { %v1071_v29 = vmax.f32 %v1031_v53, %v1036_v40  ;;  %1167 = vrot.lane.b32.xlu1 %v2772_v1, %s2266_s2  ;;  %1229 = vrot.lane.b32.xlu0 %v2783_v25, %s2265_s0  ;;  %v1097_v37 = vmax.f32 %v1072_v27, 0.0  ;;  %v850_v44 = vadd.f32 %v2539_v57, %v849_v28 }
 0x14e   :  { %v2099_v34 = vpop.f32.mrf.mxu0  ;;  %v1081_v60 = vmax.f32 %v1051_v36, %v1056_v50 }
 0x14f   :  { %v1096_v23 = vmax.f32 %v1071_v29, 0.0  ;;  %v861_v32 = vadd.f32 %v2099_v34, %v2539_v57  ;;  %v1122_v59 = vpack.c.bf16 %v1097_v37, %v1097_v37 }
 0x150   :  { %v852_v39 = vpop.f32.mrf.mxu0  ;;  %v1106_v28 = vmax.f32 %v1081_v60, 0.0 }
 0x151   :  { %v1039_v48 = vmax.f32 %v858_v11, %v861_v32  ;;  %1198 = vrot.lane.b32.xlu1 %v2783_v25, %s2267_s30  ;;  %1165 = vrot.lane.b32.xlu0 %v2783_v25, %s2266_s2  ;;  %v853_v47 = vadd.f32 %v2539_v57, %v852_v39  ;;  %v2796_v54 = vpack.c.bf16 %v1096_v23, %v1096_v23  ;;  %v1105_v23 = vmax.f32 %v2667_v45, 0.0 }
 0x152   :  { %v2102_v46 = vpop.f32.mrf.mxu0  ;;  %v1131_v11 = vpack.c.bf16 %v1106_v28, %v1106_v28 }
 0x153   :  { %v1074_v19 = vmax.f32 %v1039_v48, %v1044_v21  ;;  %v874_v6 = vadd.f32 %v2102_v46, %v2539_v57  ;;  %v1038_v52 = vmax.f32 %v850_v44, %v853_v47  ;;  %v1130_v62 = vpack.c.bf16 %v1105_v23, %v1105_v23 }
 0x154   :  { %v865_v4 = vpop.f32.mrf.mxu0 }
 0x155   :  { %1235 = vrot.lane.b32.xlu1 %v1122_v59, %s2265_s0  ;;  %1233 = vrot.lane.b32.xlu0 %v2796_v54, %s2265_s0  ;;  %v1099_v31 = vmax.f32 %v1074_v19, 0.0  ;;  %v1073_v43 = vmax.f32 %v1038_v52, %v1043_v3  ;;  %v866_v16 = vadd.f32 %v2539_v57, %v865_v4 }
 0x156   :  { %v2103_v7 = vpop.f32.mrf.mxu0 }
 0x157   :  { %v877_v13 = vadd.f32 %v2103_v7, %v2539_v57  ;;  %v2815_v49 = vpack.c.bf16 %v1099_v31, %v1099_v31  ;;  %v1098_v40 = vmax.f32 %v1073_v43, 0.0 }
 0x158   :  { %v868_v18 = vpop.f32.mrf.mxu0 }
 0x159   :  { %v1041_v21 = vmax.f32 %v874_v6, %v877_v13  ;;  %1171 = vrot.lane.b32.xlu1 %v1122_v59, %s2266_s2  ;;  %1169 = vrot.lane.b32.xlu0 %v2796_v54, %s2266_s2  ;;  %v869_v27 = vadd.f32 %v2539_v57, %v868_v18  ;;  %v1108_v59 = vpack.c.bf16 %v1083_v51, %v1083_v51 }
 0x15b   :  { %v1076_v53 = vmax.f32 %v1041_v21, %v1046_v42  ;;  %v1040_v3 = vmax.f32 %v866_v16, %v869_v27  ;;  %v2836_v42 = vpack.c.bf16 %v1098_v40, %v1098_v40 }
 0x15d   :  { %1202 = vrot.lane.b32.xlu1 %v2796_v54, %s2267_s30  ;;  %1237 = vrot.lane.b32.xlu0 %v2815_v49, %s2265_s0  ;;  %v1101_v63 = vmax.f32 %v1076_v53, 0.0  ;;  %v1075_v38 = vmax.f32 %v1040_v3, %v1045_v17  ;;  %v1057_v17 = vmax.f32 %v1002_v55, %v1005_v5 }
 0x15f   :  { %v1126_v30 = vpack.c.bf16 %v1101_v63, %v1101_v63  ;;  %v1100_v36 = vmax.f32 %v1075_v38, 0.0  ;;  %v1082_v57 = vmax.f32 %v1052_v20, %v1057_v17 }
 0x161   :  { %1206 = vrot.lane.b32.xlu1 %v2815_v49, %s2267_s30  ;;  %1173 = vrot.lane.b32.xlu0 %v2815_v49, %s2266_s2  ;;  %v2851_v34 = vpack.c.bf16 %v1100_v36, %v1100_v36  ;;  %v1107_v35 = vmax.f32 %v1082_v57, 0.0 }
 0x163   :  { %v2838_v29 = vpop.permute.xlu1 %1243  ;;  %v1132_v45 = vpack.c.bf16 %v1107_v35, %v1107_v35 }
 0x165   :  { %1210 = vrot.lane.b32.xlu1 %v1126_v30, %s2267_s30  ;;  %1204 = vrot.lane.b32.xlu0 %v2836_v42, %s2267_s30 }
 0x167   :  { %v1180_v10 = vpop.permute.xlu1 %1179 }
 0x168   :  { %v2847_v14 = vsel %vm1253_vm2, %v1126_v30, %v1180_v10 }
 0x169   :  { %1218 = vrot.lane.b32.xlu1 %v1131_v11, %s2267_s30  ;;  %1241 = vrot.lane.b32.xlu0 %v1126_v30, %s2265_s0 }
 0x16b   :  { %v1152_v2 = vpop.permute.xlu0 %1151 }
 0x16c   :  { %v1259_v44 = vsel %vm1253_vm2, %v2633_v58, %v1152_v2 }
 0x16d   :  { %1239 = vrot.lane.b32.xlu1 %v2851_v34, %s2265_s0  ;;  %1177 = vrot.lane.b32.xlu0 %v1126_v30, %s2266_s2 }
 0x16f   :  { %v1150_v20 = vpop.permute.xlu0 %1149 }
 0x170   :  { %v1256_v4 = vsel %vm1253_vm2, %v1108_v59, %v1150_v20 }
 0x171   :  { %1247 = vrot.lane.b32.xlu1 %v1130_v62, %s2265_s0  ;;  %1208 = vrot.lane.b32.xlu0 %v2851_v34, %s2267_s30 }
 0x173   :  { %v1156_v12 = vpop.permute.xlu1 %1155 }
 0x174   :  { %v1265_v58 = vsel %vm1253_vm2, %v2652_v22, %v1156_v12 }
 0x175   :  { %1175 = vrot.lane.b32.xlu1 %v2851_v34, %s2266_s2  ;;  %1216 = vrot.lane.b32.xlu0 %v1130_v62, %s2267_s30 }
 0x177   :  { %v1154_v32 = vpop.permute.xlu1 %1153 }
 0x178   :  { %v1262_v50 = vsel %vm1253_vm2, %v2620_v33, %v1154_v32 }
 0x179   :  { %1251 = vrot.lane.b32.xlu1 %v1132_v45, %s2265_s0  ;;  %1245 = vrot.lane.b32.xlu0 %v2679_v9, %s2265_s0 }
 0x17b   :  { %v2870_v37 = vpop.permute.xlu0 %1212 }
 0x17d   :  { %1249 = vrot.lane.b32.xlu0 %v1131_v11, %s2265_s0 }
 0x185   :  { %v2872_v39 = vpop.permute.xlu1 %1214 }
 0x18b   :  { %v1189_v48 = vpop.permute.xlu0 %1188 }
 0x18c   :  { %v1304_v61 = vsel %vm1302_vm3, %v1256_v4, %v1189_v48 }
 0x193   :  { %v1224_v47 = vpop.permute.xlu1 %1223  ;;  %v1193_v46 = vpop.permute.xlu0 %1192 }
 0x194   :  { %v1308_v16 = vsel %vm1302_vm3, %v1262_v50, %v1193_v46 }
 0x197   :  { %v1160_v19 = vpop.permute.xlu1 %1159  ;;  %v1222_v9 = vpop.permute.xlu0 %1221 }
 0x198   :  { %v1337_v52 = vsel %vm1335_vm4, %v1304_v61, %v1222_v9  ;;  %v1271_v33 = vsel %vm1253_vm2, %v2725_v26, %v1160_v19 }
 0x19b   :  { %v1191_v6 = vpop.permute.xlu1 %1190  ;;  %v1158_v13 = vpop.permute.xlu0 %1157 }
 0x19c   :  { %v1306_v8 = vsel %vm1302_vm3, %v1259_v44, %v1191_v6  ;;  %v1268_v55 = vsel %vm1253_vm2, %v2692_v24, %v1158_v13 }
 0x19d   :  { %v1339_v7 = vsel %vm1335_vm4, %v1306_v8, %v1224_v47 }
 0x19e   :  { %v1925_v41 = vcombine.low %v1337_v52, %v1339_v7 }
 0x19f   :  { %v1228_v31 = vpop.permute.xlu1 %1227  ;;  %v1226_v21 = vpop.permute.xlu0 %1225 }
 0x1a0   :  { %2152 = vmatprep.mubr.bf16.mxu1 %v1925_v41  ;;  %v1341_v27 = vsel %vm1335_vm4, %v1308_v16, %v1226_v21 }
 0x1a3   :  { %v1164_v18 = vpop.permute.xlu1 %1163  ;;  %v1162_v3 = vpop.permute.xlu0 %1161 }
 0x1a4   :  { %v1277_v26 = vsel %vm1253_vm2, %v2741_v0, %v1164_v18  ;;  %v1274_v24 = vsel %vm1253_vm2, %v2710_v56, %v1162_v3 }
 0x1a7   :  { %v1195_v43 = vpop.permute.xlu1 %1194 }
 0x1a8   :  { %v1310_v53 = vsel %vm1302_vm3, %v1265_v58, %v1195_v43 }
 0x1a9   :  { %v1343_v60 = vsel %vm1335_vm4, %v1310_v53, %v1228_v31 }
 0x1aa   :  { %v1926_v63 = vcombine.low %v1341_v27, %v1343_v60 }
 0x1ac   :  { %2153 = vmatmul.mubr.bf16.vlgmr.msra.gmra.mxu1 %v1926_v63 }
 0x1b3   :  { %v1197_v40 = vpop.permute.xlu0 %1196 }
 0x1b4   :  { %v1312_v11 = vsel %vm1302_vm3, %v1268_v55, %v1197_v40 }
 0x1bb   :  { %v1232_v30 = vpop.permute.xlu1 %1231  ;;  %v1201_v38 = vpop.permute.xlu0 %1200 }
 0x1bc   :  { %v1316_v32 = vsel %vm1302_vm3, %v1274_v24, %v1201_v38  ;;  %v2252_v24 = vld [vmem:[%s3030_s5 + $0x18] sm:$0xff]  }
 0x1bf   :  { %v1168_v28 = vpop.permute.xlu1 %1167  ;;  %v1230_v22 = vpop.permute.xlu0 %1229 }
 0x1c0   :  { %v1345_v17 = vsel %vm1335_vm4, %v1312_v11, %v1230_v22  ;;  %v1283_v61 = vsel %vm1253_vm2, %v2783_v25, %v1168_v28  ;;  %v2251_v11 = vld [vmem:[%s3030_s5 + $0x20] sm:$0xff]  }
 0x1c3   :  { %v1199_v5 = vpop.permute.xlu1 %1198  ;;  %v1166_v36 = vpop.permute.xlu0 %1165 }
 0x1c4   :  { %v1314_v10 = vsel %vm1302_vm3, %v1271_v33, %v1199_v5  ;;  %v1280_v56 = vsel %vm1253_vm2, %v2760_v15, %v1166_v36  ;;  %v2268_v5 = vmov 0   ;;  %v2250_v36 = vld [vmem:[%s3030_s5 + $0x28] sm:$0xff]  }
 0x1c5   :  { %v1347_v23 = vsel %vm1335_vm4, %v1314_v10, %v1232_v30  ;;  %1735 = vmatprep.subr.bf16.mxu1 %v2268_v5  ;;  %2185 = vset.pattern.permute.xlu0 %v2268_v5 }
 0x1c6   :  { %v1927_v57 = vcombine.low %v1345_v17, %v1347_v23 }
 0x1c7   :  { %v1236_v62 = vpop.permute.xlu1 %1235  ;;  %v1234_v35 = vpop.permute.xlu0 %1233 }
 0x1c8   :  { %2156 = vmatprep.mubr.bf16.mxu1 %v1927_v57  ;;  %v1349_v47 = vsel %vm1335_vm4, %v1316_v32, %v1234_v35  ;;  %v2961_v57 = vld [vmem:[%s3031_s4] ss:$0 sm:$0xff] }
 0x1cb   :  { %v1172_v45 = vpop.permute.xlu1 %1171  ;;  %v1170_v2 = vpop.permute.xlu0 %1169 }
 0x1cc   :  { %v1289_v13 = vsel %vm1253_vm2, %v2796_v54, %v1172_v45  ;;  %v1286_v15 = vsel %vm1253_vm2, %v2772_v1, %v1170_v2 }
 0x1cf   :  { %v1203_v12 = vpop.permute.xlu1 %1202  ;;  %v1238_v20 = vpop.permute.xlu0 %1237 }
 0x1d0   :  { %v1318_v48 = vsel %vm1302_vm3, %v1277_v26, %v1203_v12 }
 0x1d1   :  { %v1351_v46 = vsel %vm1335_vm4, %v1318_v48, %v1236_v62 }
 0x1d2   :  { %v1928_v51 = vcombine.low %v1349_v47, %v1351_v46 }
 0x1d3   :  { %v1207_v19 = vpop.permute.xlu1 %1206  ;;  %v1174_v59 = vpop.permute.xlu0 %1173 }
 0x1d4   :  { %2157 = vmatmul.mubr.bf16.gmra.mxu1 %v1928_v51  ;;  %v1322_v8 = vsel %vm1302_vm3, %v1283_v61, %v1207_v19  ;;  %v1292_v54 = vsel %vm1253_vm2, %v2836_v42, %v1174_v59  ;;  %v2254_v59 = vld [vmem:[%s3030_s5 + $0x8] sm:$0xff]   ;;  %v2255_v61 = vld [vmem:[%s3030_s5] sm:$0xff]  }
 0x1d5   :  { %v1328_v3 = vsel %vm1302_vm3, %v1292_v54, %v2870_v37 }
 0x1d7   :  { %v1211_v9 = vpop.permute.xlu1 %1210  ;;  %v1205_v44 = vpop.permute.xlu0 %1204 }
 0x1d8   :  { %v1320_v6 = vsel %vm1302_vm3, %v1280_v56, %v1205_v44  ;;  %v1326_v21 = vsel %vm1302_vm3, %v1289_v13, %v1211_v9 }
 0x1d9   :  { %v1353_v41 = vsel %vm1335_vm4, %v1320_v6, %v1238_v20  ;;  %v1359_v43 = vsel %vm1335_vm4, %v1326_v21, %v2838_v29  ;;  %v2253_v20 = vld [vmem:[%s3030_s5 + $0x10] sm:$0xff]  }
 0x1da   :  { %v2258_v21 = vld [vmem:[%s3030_s5 + $0x50] sm:$0xff]  }
 0x1db   :  { %v1219_v0 = vpop.permute.xlu1 %1218  ;;  %v1242_v4 = vpop.permute.xlu0 %1241 }
 0x1df   :  { %v1240_v52 = vpop.permute.xlu1 %1239  ;;  %v1178_v7 = vpop.permute.xlu0 %1177 }
 0x1e0   :  { %v1355_v31 = vsel %vm1335_vm4, %v1322_v8, %v1240_v52  ;;  %v1298_v42 = vsel %vm1253_vm2, %v2851_v34, %v1178_v7  ;;  %v2248_v34 = vld [vmem:[%s3030_s5 + $0x38] sm:$0xff]   ;;  %v2256_v7 = vld [vmem:[%s3030_s5 + $0x60] ss:$0 sps:$4 sm:$0x33]  }
 0x1e1   :  { %v1929_v18 = vcombine.low %v1353_v41, %v1355_v31  ;;  %1736 = vmatpush1.bf16.msra.mxu1 %v2248_v34  ;;  %v1733_v41 = vsel %vm1731_vm5, %v2256_v7, 0  ;;  %v2257_v31 = vld [vmem:[%s3030_s5 + $0x58] sm:$0xff]  }
 0x1e2   :  { %1737 = vmatprep.subr.bf16.mxu1 %v2268_v5 }
 0x1e3   :  { %v1248_v58 = vpop.permute.xlu1 %1247  ;;  %v1209_v50 = vpop.permute.xlu0 %1208  ;;  %2160 = vmatprep.mubr.bf16.mxu1 %v1929_v18 }
 0x1e4   :  { %v1324_v25 = vsel %vm1302_vm3, %v1286_v15, %v1209_v50 }
 0x1e5   :  { %v1357_v16 = vsel %vm1335_vm4, %v1324_v25, %v1242_v4 }
 0x1e6   :  { %v1930_v53 = vcombine.low %v1357_v16, %v1359_v43  ;;  %v2260_v16 = vld [vmem:[%s3030_s5 + $0x40] sm:$0xff]  }
 0x1e7   :  { %v1176_v27 = vpop.permute.xlu1 %1175  ;;  %v1217_v60 = vpop.permute.xlu0 %1216 }
 0x1e8   :  { %v1295_v63 = vsel %vm1253_vm2, %v2815_v49, %v1176_v27  ;;  %2161 = vmatmul.mubr.bf16.gmra.mxu1 %v1930_v53  ;;  %v1334_v49 = vsel %vm1302_vm3, %v2847_v14, %v1219_v0  ;;  %v1332_v22 = vsel %vm1302_vm3, %v1298_v42, %v1217_v60  ;;  %v2249_v14 = vld [vmem:[%s3030_s5 + $0x30] sm:$0xff]  }
 0x1e9   :  { %v1330_v1 = vsel %vm1302_vm3, %v1295_v63, %v2872_v39  ;;  %1738 = vmatpush1.bf16.msra.mxu1 %v2249_v14 }
 0x1ea   :  { %v1363_v29 = vsel %vm1335_vm4, %v1330_v1, %v1248_v58  ;;  %1739 = vmatprep.subr.bf16.mxu1 %v2268_v5  ;;  %v2259_v58 = vld [vmem:[%s3030_s5 + $0x48] sm:$0xff]   ;;  %s2270_s5 = smov 19  }
 0x1eb   :  { %v1246_v40 = vpop.permute.xlu0 %1245  ;;  %v1252_v38 = vpop.permute.xlu1 %1251 }
 0x1ec   :  { %v1361_v30 = vsel %vm1335_vm4, %v1328_v3, %v1246_v40  ;;  %v1367_v39 = vsel %vm1335_vm4, %v1334_v49, %v1252_v38 }
 0x1ed   :  { %v1931_v28 = vcombine.low %v1361_v30, %v1363_v29  ;;  %1740 = vmatpush1.bf16.msra.mxu1 %v2250_v36 }
 0x1ee   :  { %1741 = vmatprep.subr.bf16.mxu1 %v2268_v5 }
 0x1ef   :  { %v1250_v33 = vpop.permute.xlu0 %1249  ;;  %2164 = vmatprep.mubr.bf16.mxu1 %v1931_v28 }
 0x1f0   :  { %v1365_v37 = vsel %vm1335_vm4, %v1332_v22, %v1250_v33 }
 0x1f1   :  { %v1932_v55 = vcombine.low %v1365_v37, %v1367_v39  ;;  %1742 = vmatpush1.bf16.msra.mxu1 %v2251_v11 }
 0x1f2   :  { %1743 = vmatprep.subr.bf16.mxu1 %v2268_v5 }
 0x1f3   :  { %2165 = vmatmul.mubr.bf16.gmra.mxu1 %v1932_v55 }
 0x1f5   :  { %1744 = vmatpush1.bf16.msra.mxu1 %v2252_v24 }
 0x1f6   :  { %1745 = vmatprep.subr.bf16.mxu1 %v2268_v5 }
 0x1f9   :  { %1746 = vmatpush1.bf16.msra.mxu1 %v2253_v20 }
 0x1fa   :  { %1747 = vmatprep.subr.bf16.mxu1 %v2268_v5 }
 0x1fd   :  { %1748 = vmatpush1.bf16.msra.mxu1 %v2254_v59 }
 0x1fe   :  { %1749 = vmatprep.subr.bf16.mxu1 %v2268_v5 }
 0x201   :  { %1750 = vmatpush1.bf16.msra.mxu1 %v2255_v61 }
 0x202   :  { %1757 = vmatprep.subr.bf16.mxu1 %v2268_v5 }
 0x205   :  { %1758 = vmatpush2.bf16.msra.mxu1 %v1733_v41 }
 0x206   :  { %1759 = vmatprep.subr.bf16.mxu1 %v2268_v5 }
 0x209   :  { %1760 = vmatpush2.bf16.msra.mxu1 %v2257_v31 }
 0x20a   :  { %1761 = vmatprep.subr.bf16.mxu1 %v2268_v5 }
 0x20d   :  { %1762 = vmatpush2.bf16.msra.mxu1 %v2258_v21 }
 0x20e   :  { %1763 = vmatprep.subr.bf16.mxu1 %v2268_v5 }
 0x211   :  { %1764 = vmatpush2.bf16.msra.mxu1 %v2259_v58 }
 0x212   :  { %1765 = vmatprep.subr.bf16.mxu1 %v2268_v5 }
 0x215   :  { %1766 = vmatpush2.bf16.msra.mxu1 %v2260_v16 }
 0x26c   :  { %v2154_v10 = vpop.f32.mrf.mxu1 }
 0x26d   :  { %v1530_v47 = vadd.f32 %v2154_v10, %v2961_v57 }
 0x26e   :  { %v1521_v17 = vpop.f32.mrf.mxu1 }
 0x26f   :  { %v1522_v35 = vadd.f32 %v2961_v57, %v1521_v17 }
 0x270   :  { %v2155_v23 = vpop.f32.mrf.mxu1 }
 0x271   :  { %v1533_v32 = vadd.f32 %v2155_v23, %v2961_v57 }
 0x272   :  { %v1524_v62 = vpop.f32.mrf.mxu1 }
 0x273   :  { %v1525_v45 = vadd.f32 %v2961_v57, %v1524_v62  ;;  %v1585_v9 = vmax.f32 %v1530_v47, %v1533_v32  ;;  %v1941_v62 = vld [vmem:[%s3033_s6] ss:$0 sm:$0xff] }
 0x275   :  { %v1584_v2 = vmax.f32 %v1522_v35, %v1525_v45 }
 0x294   :  { %v2158_v26 = vpop.f32.mrf.mxu1 }
 0x295   :  { %v1546_v46 = vadd.f32 %v2158_v26, %v2961_v57  ;;  %v1956_v26 = vld [vmem:[%s3034_s7] ss:$0 sm:$0xff] }
 0x296   :  { %v1537_v12 = vpop.f32.mrf.mxu1 }
 0x297   :  { %v1538_v44 = vadd.f32 %v2961_v57, %v1537_v12 }
 0x298   :  { %v2159_v48 = vpop.f32.mrf.mxu1 }
 0x299   :  { %v1549_v51 = vadd.f32 %v2159_v48, %v2961_v57 }
 0x29a   :  { %v1540_v19 = vpop.f32.mrf.mxu1 }
 0x29b   :  { %v1587_v0 = vmax.f32 %v1546_v46, %v1549_v51  ;;  %v1541_v4 = vadd.f32 %v2961_v57, %v1540_v19 }
 0x29d   :  { %v1586_v56 = vmax.f32 %v1538_v44, %v1541_v4  ;;  %v1593_v6 = vmax.f32 %v1585_v9, %v1587_v0 }
 0x29f   :  { %v1592_v8 = vmax.f32 %v1584_v2, %v1586_v56  ;;  %v1597_v52 = vmax.f32 %v1593_v6, 0.0  ;;  %v1806_v56 = vlaneseq }
 0x2a1   :  { %1601 = vrot.lane.b32.xlu0 %v1597_v52, %s2269_s20  ;;  %v1596_v5 = vmax.f32 %v1592_v8, 0.0  ;;  %v1807_v6 = vand.u32 127, %v1806_v56  ;;  %v1809_v61 = vshrl.u32 %v1806_v56, 7 }
 0x2a3   :  { %v1810_v8 = vsub.s32 %v1807_v6, %v1809_v61 }
 0x2a8   :  { %v2162_v13 = vpop.f32.mrf.mxu1 }
 0x2a9   :  { %v1562_v60 = vadd.f32 %v2162_v13, %v2961_v57 }
 0x2aa   :  { %v1553_v18 = vpop.f32.mrf.mxu1 }
 0x2ab   :  { %v1554_v3 = vadd.f32 %v2961_v57, %v1553_v18 }
 0x2ac   :  { %v2163_v15 = vpop.f32.mrf.mxu1 }
 0x2ad   :  { %v1565_v53 = vadd.f32 %v2163_v15, %v2961_v57 }
 0x2ae   :  { %v1556_v50 = vpop.f32.mrf.mxu1 }
 0x2af   :  { %v1557_v54 = vadd.f32 %v2961_v57, %v1556_v50  ;;  %v1589_v29 = vmax.f32 %v1562_v60, %v1565_v53 }
 0x2b1   :  { %v1588_v42 = vmax.f32 %v1554_v3, %v1557_v54 }
 0x2b3   :  { %v2166_v25 = vpop.f32.mrf.mxu1 }
 0x2b4   :  { %v1578_v63 = vadd.f32 %v2166_v25, %v2961_v57 }
 0x2b5   :  { %v1569_v43 = vpop.f32.mrf.mxu1 }
 0x2b6   :  { %v1570_v30 = vadd.f32 %v2961_v57, %v1569_v43 }
 0x2b7   :  { %v2167_v27 = vpop.f32.mrf.mxu1 }
 0x2b8   :  { %v1581_v1 = vadd.f32 %v2167_v27, %v2961_v57 }
 0x2b9   :  { %v1572_v40 = vpop.f32.mrf.mxu1 }
 0x2ba   :  { %v1591_v38 = vmax.f32 %v1578_v63, %v1581_v1  ;;  %v1573_v28 = vadd.f32 %v2961_v57, %v1572_v40  ;;  %v14_v57 = vstv %s3032_s8 }
 0x2bb   :  { %15 = vst [vmem:[#allocation2] sm:$0x1] %v14_v57 }
 0x2bc   :  { %v1590_v49 = vmax.f32 %v1570_v30, %v1573_v28  ;;  %v1595_v22 = vmax.f32 %v1589_v29, %v1591_v38 }
 0x2be   :  { %v1599_v33 = vmax.f32 %v1595_v22, 0.0  ;;  %v1594_v39 = vmax.f32 %v1588_v42, %v1590_v49 }
 0x2c0   :  { %1609 = vrot.lane.b32.xlu0 %v1599_v33, %s2270_s5  ;;  %v1598_v37 = vmax.f32 %v1594_v39, 0.0 }
 0x2c2   :  { %1605 = vrot.lane.b32.xlu1 %v1598_v37, %s2271_s27  ;;  %v1957_v47 = vld [vmem:[#allocation2] ss:$0 sm:$0xff] }
 0x313   :  { %v1602_v55 = vpop.permute.xlu0 %1601 }
 0x314   :  { %v1613_v34 = vsel %vm1612_vm6, %v1596_v5, %v1602_v55 }
 0x332   :  { %v1610_v14 = vpop.permute.xlu0 %1609 }
 0x334   :  { %v1606_v36 = vpop.permute.xlu1 %1605 }
 0x335   :  { %v1615_v11 = vsel %vm1614_vm7, %v1613_v34, %v1606_v36  ;;  %v1617_v10 = vsel %vm1616_vm8, %v1606_v36, %v1610_v14 }
 0x336   :  { %v1618_v17 = vpack.c.bf16 %v1615_v11, %v1615_v11  ;;  %v1619_v23 = vpack.c.bf16 %v1617_v10, %v1617_v10 }
 0x338   :  { %1955 = vmatprep.mubr.msk.bf16.mxu1 %vm1727_vm9, %v1619_v23 }
 0x339   :  { %1768 = vmatmul.mubr.bf16.vlgmr.msra.gmra.mxu1 %v1618_v17 }
 0x3f9   :  { %v1769_v35 = vpop.f32.mrf.mxu1 }
 0x3fa   :  { %v1770_v45 = vadd.f32 %v1941_v62, %v1769_v35 }
 0x3fb   :  { %v1771_v2 = vpop.f32.mrf.mxu1 }
 0x3fc   :  { %v1775_v24 = vmax.f32 %v1770_v45, 0.0 }
 0x3fd   :  { %v1772_v12 = vpop.f32.mrf.mxu1 }
 0x3fe   :  { %v1783_v20 = vmul.f32 %v1956_v26, %v1775_v24 }
 0x3ff   :  { %v1773_v32 = vpop.f32.mrf.mxu1 }
 0x400   :  { %v1785_v48 = vsel %vm1784_vm10, %v1783_v20, 0.0 }
 0x401   :  { %1786 = vadd.xlane.f32.xlu1 %v1785_v48 }
 0x48a   :  { %v1787_v46 = vpop.xlane.xlu1 %1786 }
 0x48b   :  { %v1795_v51 = vadd.f32 %v1957_v47, %v1787_v46 }
 0x48d   :  { %v1796_v19 = vmax.f32 %v1795_v51, 0.0 }
 0x48f   :  { %v1797_v59 = vsub.f32 0.0, %v1796_v19 }
 0x491   :  { %v1798_v9 = vmul.f32 1.442695, %v1797_v59 }
 0x493   :  { %2261 = vpow2.f32 %v1798_v9 }
 0x4a0   :  { %v2262_v44 = vpop.eup %2261 }
 0x4a1   :  { %v1800_v0 = vadd.f32 1.0, %v2262_v44 }
 0x4a3   :  { %2263 = vrcp.f32 %v1800_v0 }
 0x4b0   :  { %v2264_v4 = vpop.eup %2263 }
 0x4b1   :  { %1804 = vperm.xlu0 %2185, %v2264_v4  }
 0x52c   :  { %v1805_v52 = vpop.permute.xlu0 %1804 }
 0x52d   :  { %v1811_v7 = vrot.slane %v1805_v52, %v1810_v8 }
 0x52f   :  { %1814 = vst.msk [vmem:[%s3035_s9] sm:$0x1] %vm1813_vm11, %v1811_v7 }

</bundles_post_ra>
